<compile_context>
chip_gen: v5e
topology: v5e:2x2
jax: 0.10.0
libtpu: 0.0.40
codegen_flags: <defaults>
</compile_context>

<pallas_src>
import functools

import jax
import jax.numpy as jnp
from jax.experimental import pallas as pl
from jax.experimental.pallas import tpu as pltpu


def _mha_kernel(x_ref, wq_ref, bq_ref, wk_ref, bk_ref, wv_ref, bv_ref,
                wo_ref, bo_ref, z_ref, *, n_heads, d_k, d_v, scale, masked_heads):
    f32 = jnp.float32
    Bt, S, D = x_ref.shape
    H = n_heads
    M = Bt * S
    mxu_dtype = x_ref.dtype            # bf16 when the wrapper casts, else f32

    x = x_ref[...].reshape(M, D)       # leading-dim merge only (no lane relayout)

    # Fused big-M projections (one MXU matmul each, f32 accumulation, f32 bias).
    # Softmax scale folded into q (cheaper than scaling (Bt, S, S) scores per head).
    q = (jnp.dot(x, wq_ref[...], preferred_element_type=f32)
         + bq_ref[...].astype(f32)) * scale
    k = jnp.dot(x, wk_ref[...], preferred_element_type=f32) + bk_ref[...].astype(f32)
    v = jnp.dot(x, wv_ref[...], preferred_element_type=f32) + bv_ref[...].astype(f32)

    q3 = q.reshape(Bt, S, H * d_k).astype(mxu_dtype)
    k3 = k.reshape(Bt, S, H * d_k).astype(mxu_dtype)
    v3 = v.reshape(Bt, S, H * d_v).astype(mxu_dtype)

    if masked_heads:
        # Head separation via 0/1 column masks on full-width operands: zeroing the other
        # heads' columns makes the full H*d_k contraction equal the per-head dot product,
        # with no lane slices, no lane concat, and ctx accumulated directly at (…, H*d_v)
        # so the output projection is a single matmul with K = H*d_v.
        col_k = jax.lax.broadcasted_iota(jnp.int32, (1, 1, H * d_k), 2)
        col_v = jax.lax.broadcasted_iota(jnp.int32, (1, 1, H * d_v), 2)
        zq = jnp.zeros_like(q3)
        zv = jnp.zeros_like(v3)
        ctx = None
        for h in range(H):                                   # static loop, traced once
            mk = (col_k >= h * d_k) & (col_k < (h + 1) * d_k)
            mv = (col_v >= h * d_v) & (col_v < (h + 1) * d_v)
            qh = jnp.where(mk, q3, zq)                       # (Bt, S, H*d_k)
            vh = jnp.where(mv, v3, zv)                       # (Bt, S, H*d_v)
            s = jnp.einsum('bqc,bkc->bqk', qh, k3,
                           preferred_element_type=f32)       # per-head scores (Bt,S,S)
            s = s - jnp.max(s, axis=-1, keepdims=True)       # stable softmax, f32
            e = jnp.exp(s)
            attn = e * pl.reciprocal(jnp.sum(e, axis=-1, keepdims=True), approx=True)
            c = jnp.einsum('bqk,bkc->bqc', attn.astype(mxu_dtype), vh,
                           preferred_element_type=f32)       # nonzero only in head-h cols
            ctx = c if ctx is None else ctx + c
        # Single output projection against the full W_O (K = H*d_v fills the MXU).
        z = jnp.dot(ctx.reshape(M, H * d_v).astype(mxu_dtype), wo_ref[...],
                    preferred_element_type=f32) + bo_ref[...].astype(f32)
    else:
        # Large-d_model fallback: per-head lane slices keep attention matmuls at
        # K = d_k / N = d_v; output projection accumulates per-head W_O slabs.
        z = bo_ref[...].astype(f32)                          # (1, D), broadcasts on add
        for h in range(H):
            qh = q3[:, :, h * d_k:(h + 1) * d_k]
            kh = k3[:, :, h * d_k:(h + 1) * d_k]
            vh = v3[:, :, h * d_v:(h + 1) * d_v]
            s = jnp.einsum('bqd,bkd->bqk', qh, kh, preferred_element_type=f32)
            s = s - jnp.max(s, axis=-1, keepdims=True)
            e = jnp.exp(s)
            attn = e * pl.reciprocal(jnp.sum(e, axis=-1, keepdims=True), approx=True)
            ch = jnp.einsum('bqk,bkd->bqd', attn.astype(mxu_dtype), vh,
                            preferred_element_type=f32)
            z = z + jnp.dot(ch.reshape(M, d_v).astype(mxu_dtype),
                            wo_ref[h * d_v:(h + 1) * d_v, :],
                            preferred_element_type=f32)

    z_ref[...] = z.reshape(Bt, S, D).astype(z_ref.dtype)


def _largest_divisor_leq(n, cap):
    cap = int(max(1, min(cap, n)))
    for d in range(cap, 0, -1):
        if n % d == 0:
            return d
    return 1


def _vmem_budget_bytes():
    cap = None
    try:
        cap = int(pltpu.get_tpu_info().vmem_capacity_bytes)
    except Exception:
        cap = None
    if not cap:
        cap = 64 * 1024 * 1024          # conservative fallback (v7x per-core VMEM)
    cap = max(32 * 1024 * 1024, min(cap, 128 * 1024 * 1024))
    return int(cap * 0.7)               # leave headroom for compiler-internal scratch


def _choose_block_b(B, S, D, H, d_k, d_v, elem_bytes, vmem_budget):
    # Target ~512 flattened rows per step so the projection matmuls fill MXU M on
    # every generation (no artificial "grid >= 2" halving for single-TC chips).
    bt_rows = max(1, -(-512 // max(1, S)))
    c_qk, c_v = H * d_k, H * d_v
    # Per-sequence live-set estimate (f32 intermediates + double-buffered I/O tiles).
    per_seq = (2 * elem_bytes * S * D            # x tile, double buffered
               + 2 * 4 * S * D                   # out tile (f32), double buffered
               + 4 * S * (2 * c_qk + c_v)        # q, k, v in f32
               + elem_bytes * S * (2 * c_qk + c_v)   # q3/k3/v3 cast copies
               + 3 * 4 * S * S                   # one head's scores / exp / attn (f32)
               + 2 * 4 * S * c_v                 # ctx accumulator (+ transient)
               + 4 * S * D)                      # z in f32
    fixed = (2 * elem_bytes * (2 * D * c_qk + D * c_v + c_v * D)   # weights, 2 buffers
             + 4 * (2 * c_qk + c_v + D)                            # biases (f32)
             + (4 << 20))                                          # slack
    bt_vmem = max(1, (vmem_budget - fixed) // max(1, per_seq))
    bt = int(max(1, min(bt_rows, bt_vmem, B)))
    bt = _largest_divisor_leq(B, bt)             # divisor of B: no padding, no tail waste
    # If it costs nothing (per-tile rows stay >= 256), use >= 4 grid steps so v7x's two
    # TensorCores each pipeline >= 2 steps; harmless on single-core v5e/v6e.
    if B // bt < 4:
        alt = _largest_divisor_leq(B, max(1, B // 4))
        if alt * S >= 256:
            bt = alt
    return bt


def temporal_attention_layer(x, params, *, n_heads, mxu_dtype=jnp.bfloat16, block_b=None):
    """x: [bs, n_vars, patch_num, d_model] -> z: [bs, n_vars, patch_num, d_model]"""
    bs, n_vars, S, D = x.shape
    B = bs * n_vars
    H = n_heads
    d_k = params["wq"].shape[1] // H
    d_v = params["wv"].shape[1] // H
    scale = float(d_k) ** (-0.5)        # _ScaledDotProductAttention.scale (lsa=False)

    orig_dtype = x.dtype
    u = x.reshape(B, S, D)

    cast = (lambda a: a.astype(mxu_dtype)) if mxu_dtype is not None else (lambda a: a)
    elem_bytes = jnp.dtype(mxu_dtype if mxu_dtype is not None else orig_dtype).itemsize

    budget = _vmem_budget_bytes()
    Bt = block_b if block_b is not None else _choose_block_b(
        B, S, D, H, d_k, d_v, elem_bytes, budget)
    if B % Bt != 0:                      # only reachable with an explicit block_b
        Bt = _largest_divisor_leq(B, Bt)
    nb = B // Bt

    u_c = cast(u)
    wq, wk, wv = cast(params["wq"]), cast(params["wk"]), cast(params["wv"])
    wo = cast(params["wo"])                              # kept as (H*d_v, D)
    bq = params["bq"].astype(jnp.float32)
    bk = params["bk"].astype(jnp.float32)
    bv = params["bv"].astype(jnp.float32)
    bo = params["bo"].astype(jnp.float32)

    # Mask-based head separation costs no extra MXU pushes while H*d_k / H*d_v fit a
    # single MXU contraction pass (<= 256 on v6e/v7x; on v5e d_model in (128, 256]
    # pays at most 2x pushes on attention matmuls that are far from MXU-bound here).
    masked_heads = (H * d_k <= 256) and (H * d_v <= 256)

    kernel = functools.partial(_mha_kernel, n_heads=H, d_k=d_k, d_v=d_v,
                               scale=scale, masked_heads=masked_heads)

    def full(a):
        nd = a.ndim
        return pl.BlockSpec(a.shape, lambda b, _nd=nd: (0,) * _nd)

    flops = (2 * B * S * D * (2 * H * d_k + H * d_v)     # Q/K/V projections
             + 2 * B * H * S * S * (d_k + d_v)            # scores + attn @ V
             + 2 * B * S * (H * d_v) * D)                 # output projection
    transcendentals = B * H * S * S                       # exp
    bytes_accessed = (u_c.nbytes + B * S * D * jnp.dtype(orig_dtype).itemsize
                      + sum(a.nbytes for a in (wq, wk, wv, wo, bq, bk, bv, bo)))

    z = pl.pallas_call(
        kernel,
        out_shape=jax.ShapeDtypeStruct((B, S, D), orig_dtype),
        grid_spec=pltpu.PrefetchScalarGridSpec(
            num_scalar_prefetch=0,
            grid=(nb,),
            in_specs=[
                pl.BlockSpec((Bt, S, D), lambda b: (b, 0, 0)),   # x tile (Bt sequences)
                full(wq), full(bq),
                full(wk), full(bk),
                full(wv), full(bv),
                full(wo), full(bo),
            ],
            out_specs=pl.BlockSpec((Bt, S, D), lambda b: (b, 0, 0)),
        ),
        compiler_params=pltpu.CompilerParams(
            dimension_semantics=("parallel",),
            vmem_limit_bytes=int(budget)),
        cost_estimate=pl.CostEstimate(flops=int(flops),
                                      transcendentals=int(transcendentals),
                                      bytes_accessed=int(bytes_accessed)),
    )(u_c, wq, bq, wk, bk, wv, bv, wo, bo)

    return z.reshape(bs, n_vars, S, D)


def init_params(key, d_model, n_heads, d_k=None, d_v=None, dtype=jnp.float32):
    d_k = d_model // n_heads if d_k is None else d_k
    d_v = d_model // n_heads if d_v is None else d_v
    ks = jax.random.split(key, 8)
    s = 0.02
    return {
        # stored as (in_features, out_features) so the kernel does x @ W + b
        "wq": s * jax.random.normal(ks[0], (d_model, n_heads * d_k), dtype),
        "bq": s * jax.random.normal(ks[1], (1, n_heads * d_k), dtype),
        "wk": s * jax.random.normal(ks[2], (d_model, n_heads * d_k), dtype),
        "bk": s * jax.random.normal(ks[3], (1, n_heads * d_k), dtype),
        "wv": s * jax.random.normal(ks[4], (d_model, n_heads * d_v), dtype),
        "bv": s * jax.random.normal(ks[5], (1, n_heads * d_v), dtype),
        "wo": s * jax.random.normal(ks[6], (n_heads * d_v, d_model), dtype),
        "bo": s * jax.random.normal(ks[7], (1, d_model), dtype),
    }


def _reference(x, params, n_heads):
    """Pure-JAX (f32) transcription of TemporalAttentionLayer.forward (eval mode)."""
    bs, nv, S, D = x.shape
    B = bs * nv
    H = n_heads
    d_k = params["wq"].shape[1] // H
    d_v = params["wv"].shape[1] // H
    u = x.reshape(B, S, D)
    q = u @ params["wq"] + params["bq"]
    k = u @ params["wk"] + params["bk"]
    v = u @ params["wv"] + params["bv"]
    q = q.reshape(B, S, H, d_k).transpose(0, 2, 1, 3)
    k = k.reshape(B, S, H, d_k).transpose(0, 2, 1, 3)
    v = v.reshape(B, S, H, d_v).transpose(0, 2, 1, 3)
    s = jnp.einsum('bhqd,bhkd->bhqk', q, k) * (float(d_k) ** (-0.5))
    a = jax.nn.softmax(s, axis=-1)
    o = jnp.einsum('bhqk,bhkd->bhqd', a, v)
    o = o.transpose(0, 2, 1, 3).reshape(B, S, H * d_v)
    z = o @ params["wo"] + params["bo"]
    return z.reshape(bs, nv, S, D)


if __name__ == "__main__":
    # small shapes consistent with the module
    bs, n_vars, patch_num, d_model, n_heads = 2, 4, 8, 32, 4

    key = jax.random.PRNGKey(0)
    kx, kp = jax.random.split(key)
    x = jax.random.normal(kx, (bs, n_vars, patch_num, d_model), jnp.float32)
    params = init_params(kp, d_model, n_heads)

    # f32 parity check against the pure-JAX reference.
    z_f32 = jax.block_until_ready(
        temporal_attention_layer(x, params, n_heads=n_heads, mxu_dtype=None))
    z_ref = jax.block_until_ready(_reference(x, params, n_heads))
    assert z_f32.shape == z_ref.shape
    max_err = float(jnp.max(jnp.abs(z_f32 - z_ref)))
    assert max_err < 3e-3, f"parity error vs reference: {max_err}"

    # default path (bf16 MXU operands, f32 accumulation)
    z = jax.block_until_ready(temporal_attention_layer(x, params, n_heads=n_heads))
    assert z.shape == (bs, n_vars, patch_num, d_model)
    assert bool(jnp.all(jnp.isfinite(z)))
    print("KERNEL_OK")
</pallas_src>

<mosaic_0001>
module attributes {stable_mosaic.version = 11 : i64} {
  func.func @_mha_kernel(%arg0: i32, %arg1: memref<8x8x32xf32, #tpu.memory_space<vmem>>, %arg2: memref<32x32xf32, #tpu.memory_space<vmem>>, %arg3: memref<1x32xf32, #tpu.memory_space<vmem>>, %arg4: memref<32x32xf32, #tpu.memory_space<vmem>>, %arg5: memref<1x32xf32, #tpu.memory_space<vmem>>, %arg6: memref<32x32xf32, #tpu.memory_space<vmem>>, %arg7: memref<1x32xf32, #tpu.memory_space<vmem>>, %arg8: memref<32x32xf32, #tpu.memory_space<vmem>>, %arg9: memref<1x32xf32, #tpu.memory_space<vmem>>, %arg10: memref<8x8x32xf32, #tpu.memory_space<vmem>>) attributes {dimension_semantics = [#tpu.dimension_semantics<parallel>], iteration_bounds = array<i64: 1>, scalar_prefetch = 0 : i64, scratch_operands = 0 : i64, tpu.core_type = #tpu.core_type<tc>, window_params = [{transform_indices = @transform_0, window_bounds = array<i64: 8, 8, 32>}, {pipeline_mode = #tpu.pipeline_mode<synchronous>, transform_indices = @transform_1, window_bounds = array<i64: 32, 32>}, {pipeline_mode = #tpu.pipeline_mode<synchronous>, transform_indices = @transform_2, window_bounds = array<i64: 1, 32>}, {pipeline_mode = #tpu.pipeline_mode<synchronous>, transform_indices = @transform_3, window_bounds = array<i64: 32, 32>}, {pipeline_mode = #tpu.pipeline_mode<synchronous>, transform_indices = @transform_4, window_bounds = array<i64: 1, 32>}, {pipeline_mode = #tpu.pipeline_mode<synchronous>, transform_indices = @transform_5, window_bounds = array<i64: 32, 32>}, {pipeline_mode = #tpu.pipeline_mode<synchronous>, transform_indices = @transform_6, window_bounds = array<i64: 1, 32>}, {pipeline_mode = #tpu.pipeline_mode<synchronous>, transform_indices = @transform_7, window_bounds = array<i64: 32, 32>}, {pipeline_mode = #tpu.pipeline_mode<synchronous>, transform_indices = @transform_8, window_bounds = array<i64: 1, 32>}, {transform_indices = @transform_9, window_bounds = array<i64: 8, 8, 32>}]} {
    %c0 = arith.constant 0 : index
    %c0_0 = arith.constant 0 : index
    %c0_1 = arith.constant 0 : index
    %0 = vector.load %arg1[%c0, %c0_0, %c0_1] : memref<8x8x32xf32, #tpu.memory_space<vmem>>, vector<8x8x32xf32>
    %1 = vector.shape_cast %0 : vector<8x8x32xf32> to vector<64x32xf32>
    %c0_2 = arith.constant 0 : index
    %c0_3 = arith.constant 0 : index
    %2 = vector.load %arg2[%c0_2, %c0_3] : memref<32x32xf32, #tpu.memory_space<vmem>>, vector<32x32xf32>
    %cst = arith.constant dense<0.000000e+00> : vector<64x32xf32>
    %3 = tpu.matmul %1, %2, %cst {dimension_numbers = #tpu.dot_dimension_numbers<[1], [0], [0], [1], [0, 0, 1, 1], [], []>} : vector<64x32xf32>, vector<32x32xf32>, vector<64x32xf32> -> vector<64x32xf32>
    %c0_4 = arith.constant 0 : index
    %c0_5 = arith.constant 0 : index
    %4 = vector.load %arg3[%c0_4, %c0_5] : memref<1x32xf32, #tpu.memory_space<vmem>>, vector<1x32xf32>
    %5 = vector.broadcast %4 : vector<1x32xf32> to vector<64x32xf32>
    %6 = arith.addf %3, %5 : vector<64x32xf32>
    %cst_6 = arith.constant 0.353553385 : f32
    %7 = vector.broadcast %cst_6 : f32 to vector<64x32xf32>
    %8 = arith.mulf %6, %7 : vector<64x32xf32>
    %c0_7 = arith.constant 0 : index
    %c0_8 = arith.constant 0 : index
    %9 = vector.load %arg4[%c0_7, %c0_8] : memref<32x32xf32, #tpu.memory_space<vmem>>, vector<32x32xf32>
    %cst_9 = arith.constant dense<0.000000e+00> : vector<64x32xf32>
    %10 = tpu.matmul %1, %9, %cst_9 {dimension_numbers = #tpu.dot_dimension_numbers<[1], [0], [0], [1], [0, 0, 1, 1], [], []>} : vector<64x32xf32>, vector<32x32xf32>, vector<64x32xf32> -> vector<64x32xf32>
    %c0_10 = arith.constant 0 : index
    %c0_11 = arith.constant 0 : index
    %11 = vector.load %arg5[%c0_10, %c0_11] : memref<1x32xf32, #tpu.memory_space<vmem>>, vector<1x32xf32>
    %12 = vector.broadcast %11 : vector<1x32xf32> to vector<64x32xf32>
    %13 = arith.addf %10, %12 : vector<64x32xf32>
    %c0_12 = arith.constant 0 : index
    %c0_13 = arith.constant 0 : index
    %14 = vector.load %arg6[%c0_12, %c0_13] : memref<32x32xf32, #tpu.memory_space<vmem>>, vector<32x32xf32>
    %cst_14 = arith.constant dense<0.000000e+00> : vector<64x32xf32>
    %15 = tpu.matmul %1, %14, %cst_14 {dimension_numbers = #tpu.dot_dimension_numbers<[1], [0], [0], [1], [0, 0, 1, 1], [], []>} : vector<64x32xf32>, vector<32x32xf32>, vector<64x32xf32> -> vector<64x32xf32>
    %c0_15 = arith.constant 0 : index
    %c0_16 = arith.constant 0 : index
    %16 = vector.load %arg7[%c0_15, %c0_16] : memref<1x32xf32, #tpu.memory_space<vmem>>, vector<1x32xf32>
    %17 = vector.broadcast %16 : vector<1x32xf32> to vector<64x32xf32>
    %18 = arith.addf %15, %17 : vector<64x32xf32>
    %19 = vector.shape_cast %8 : vector<64x32xf32> to vector<8x8x32xf32>
    %20 = vector.shape_cast %13 : vector<64x32xf32> to vector<8x8x32xf32>
    %21 = vector.shape_cast %18 : vector<64x32xf32> to vector<8x8x32xf32>
    %22 = tpu.iota {dimensions = array<i32: 2>} : vector<1x1x32xi32>
    %23 = tpu.iota {dimensions = array<i32: 2>} : vector<1x1x32xi32>
    %cst_17 = arith.constant 0.000000e+00 : f32
    %24 = vector.broadcast %cst_17 : f32 to vector<8x8x32xf32>
    %cst_18 = arith.constant 0.000000e+00 : f32
    %25 = vector.broadcast %cst_18 : f32 to vector<8x8x32xf32>
    %c0_i32 = arith.constant 0 : i32
    %26 = vector.broadcast %c0_i32 : i32 to vector<1x1x32xi32>
    %27 = arith.cmpi sge, %22, %26 : vector<1x1x32xi32>
    %c8_i32 = arith.constant 8 : i32
    %28 = vector.broadcast %c8_i32 : i32 to vector<1x1x32xi32>
    %29 = arith.cmpi slt, %22, %28 : vector<1x1x32xi32>
    %30 = arith.andi %27, %29 : vector<1x1x32xi1>
    %c0_i32_19 = arith.constant 0 : i32
    %31 = vector.broadcast %c0_i32_19 : i32 to vector<1x1x32xi32>
    %32 = arith.cmpi sge, %23, %31 : vector<1x1x32xi32>
    %c8_i32_20 = arith.constant 8 : i32
    %33 = vector.broadcast %c8_i32_20 : i32 to vector<1x1x32xi32>
    %34 = arith.cmpi slt, %23, %33 : vector<1x1x32xi32>
    %35 = arith.andi %32, %34 : vector<1x1x32xi1>
    %36 = vector.shape_cast %30 : vector<1x1x32xi1> to vector<1x1x32xi1>
    %37 = vector.broadcast %36 : vector<1x1x32xi1> to vector<8x8x32xi1>
    %38 = arith.select %37, %19, %24 : vector<8x8x32xi1>, vector<8x8x32xf32>
    %39 = vector.shape_cast %35 : vector<1x1x32xi1> to vector<1x1x32xi1>
    %40 = vector.broadcast %39 : vector<1x1x32xi1> to vector<8x8x32xi1>
    %41 = arith.select %40, %21, %25 : vector<8x8x32xi1>, vector<8x8x32xf32>
    "tpu.trace_start"() <{level = 10 : i32, message = "bqc,bkc->bqk"}> : () -> ()
    %cst_21 = arith.constant dense<0.000000e+00> : vector<8x8x8xf32>
    %42 = tpu.matmul %38, %20, %cst_21 {dimension_numbers = #tpu.dot_dimension_numbers<[2], [2], [1], [1], [0, 0, 0, 1, 1, 1], [0], [0]>} : vector<8x8x32xf32>, vector<8x8x32xf32>, vector<8x8x8xf32> -> vector<8x8x8xf32>
    "tpu.trace_stop"() : () -> ()
    %cst_22 = arith.constant dense<0xFF800000> : vector<8x8xf32>
    %43 = vector.multi_reduction <maximumf>, %42, %cst_22 [2] : vector<8x8x8xf32> to vector<8x8xf32>
    %44 = vector.shape_cast %43 : vector<8x8xf32> to vector<8x8x1xf32>
    %45 = vector.broadcast %44 : vector<8x8x1xf32> to vector<8x8x8xf32>
    %46 = arith.subf %42, %45 : vector<8x8x8xf32>
    %47 = math.exp %46 : vector<8x8x8xf32>
    %cst_23 = arith.constant dense<0.000000e+00> : vector<8x8xf32>
    %48 = vector.multi_reduction <add>, %47, %cst_23 [2] : vector<8x8x8xf32> to vector<8x8xf32>
    %49 = vector.shape_cast %48 : vector<8x8xf32> to vector<8x8x1xf32>
    %50 = tpu.reciprocal %49 {approx = true} : vector<8x8x1xf32> -> vector<8x8x1xf32>
    %51 = vector.broadcast %50 : vector<8x8x1xf32> to vector<8x8x8xf32>
    %52 = arith.mulf %47, %51 : vector<8x8x8xf32>
    "tpu.trace_start"() <{level = 10 : i32, message = "bqk,bkc->bqc"}> : () -> ()
    %cst_24 = arith.constant dense<0.000000e+00> : vector<8x8x32xf32>
    %53 = tpu.matmul %52, %41, %cst_24 {dimension_numbers = #tpu.dot_dimension_numbers<[2], [1], [1], [2], [0, 0, 0, 1, 1, 2], [0], [0]>} : vector<8x8x8xf32>, vector<8x8x32xf32>, vector<8x8x32xf32> -> vector<8x8x32xf32>
    %c8_i32_25 = arith.constant 8 : i32
    "tpu.trace_stop"() : () -> ()
    %54 = vector.broadcast %c8_i32_25 : i32 to vector<1x1x32xi32>
    %55 = arith.cmpi sge, %22, %54 : vector<1x1x32xi32>
    %c16_i32 = arith.constant 16 : i32
    %56 = vector.broadcast %c16_i32 : i32 to vector<1x1x32xi32>
    %57 = arith.cmpi slt, %22, %56 : vector<1x1x32xi32>
    %58 = arith.andi %55, %57 : vector<1x1x32xi1>
    %c8_i32_26 = arith.constant 8 : i32
    %59 = vector.broadcast %c8_i32_26 : i32 to vector<1x1x32xi32>
    %60 = arith.cmpi sge, %23, %59 : vector<1x1x32xi32>
    %c16_i32_27 = arith.constant 16 : i32
    %61 = vector.broadcast %c16_i32_27 : i32 to vector<1x1x32xi32>
    %62 = arith.cmpi slt, %23, %61 : vector<1x1x32xi32>
    %63 = arith.andi %60, %62 : vector<1x1x32xi1>
    %64 = vector.shape_cast %58 : vector<1x1x32xi1> to vector<1x1x32xi1>
    %65 = vector.broadcast %64 : vector<1x1x32xi1> to vector<8x8x32xi1>
    %66 = arith.select %65, %19, %24 : vector<8x8x32xi1>, vector<8x8x32xf32>
    %67 = vector.shape_cast %63 : vector<1x1x32xi1> to vector<1x1x32xi1>
    %68 = vector.broadcast %67 : vector<1x1x32xi1> to vector<8x8x32xi1>
    %69 = arith.select %68, %21, %25 : vector<8x8x32xi1>, vector<8x8x32xf32>
    "tpu.trace_start"() <{level = 10 : i32, message = "bqc,bkc->bqk"}> : () -> ()
    %cst_28 = arith.constant dense<0.000000e+00> : vector<8x8x8xf32>
    %70 = tpu.matmul %66, %20, %cst_28 {dimension_numbers = #tpu.dot_dimension_numbers<[2], [2], [1], [1], [0, 0, 0, 1, 1, 1], [0], [0]>} : vector<8x8x32xf32>, vector<8x8x32xf32>, vector<8x8x8xf32> -> vector<8x8x8xf32>
    "tpu.trace_stop"() : () -> ()
    %cst_29 = arith.constant dense<0xFF800000> : vector<8x8xf32>
    %71 = vector.multi_reduction <maximumf>, %70, %cst_29 [2] : vector<8x8x8xf32> to vector<8x8xf32>
    %72 = vector.shape_cast %71 : vector<8x8xf32> to vector<8x8x1xf32>
    %73 = vector.broadcast %72 : vector<8x8x1xf32> to vector<8x8x8xf32>
    %74 = arith.subf %70, %73 : vector<8x8x8xf32>
    %75 = math.exp %74 : vector<8x8x8xf32>
    %cst_30 = arith.constant dense<0.000000e+00> : vector<8x8xf32>
    %76 = vector.multi_reduction <add>, %75, %cst_30 [2] : vector<8x8x8xf32> to vector<8x8xf32>
    %77 = vector.shape_cast %76 : vector<8x8xf32> to vector<8x8x1xf32>
    %78 = tpu.reciprocal %77 {approx = true} : vector<8x8x1xf32> -> vector<8x8x1xf32>
    %79 = vector.broadcast %78 : vector<8x8x1xf32> to vector<8x8x8xf32>
    %80 = arith.mulf %75, %79 : vector<8x8x8xf32>
    "tpu.trace_start"() <{level = 10 : i32, message = "bqk,bkc->bqc"}> : () -> ()
    %cst_31 = arith.constant dense<0.000000e+00> : vector<8x8x32xf32>
    %81 = tpu.matmul %80, %69, %cst_31 {dimension_numbers = #tpu.dot_dimension_numbers<[2], [1], [1], [2], [0, 0, 0, 1, 1, 2], [0], [0]>} : vector<8x8x8xf32>, vector<8x8x32xf32>, vector<8x8x32xf32> -> vector<8x8x32xf32>
    "tpu.trace_stop"() : () -> ()
    %82 = arith.addf %53, %81 : vector<8x8x32xf32>
    %c16_i32_32 = arith.constant 16 : i32
    %83 = vector.broadcast %c16_i32_32 : i32 to vector<1x1x32xi32>
    %84 = arith.cmpi sge, %22, %83 : vector<1x1x32xi32>
    %c24_i32 = arith.constant 24 : i32
    %85 = vector.broadcast %c24_i32 : i32 to vector<1x1x32xi32>
    %86 = arith.cmpi slt, %22, %85 : vector<1x1x32xi32>
    %87 = arith.andi %84, %86 : vector<1x1x32xi1>
    %c16_i32_33 = arith.constant 16 : i32
    %88 = vector.broadcast %c16_i32_33 : i32 to vector<1x1x32xi32>
    %89 = arith.cmpi sge, %23, %88 : vector<1x1x32xi32>
    %c24_i32_34 = arith.constant 24 : i32
    %90 = vector.broadcast %c24_i32_34 : i32 to vector<1x1x32xi32>
    %91 = arith.cmpi slt, %23, %90 : vector<1x1x32xi32>
    %92 = arith.andi %89, %91 : vector<1x1x32xi1>
    %93 = vector.shape_cast %87 : vector<1x1x32xi1> to vector<1x1x32xi1>
    %94 = vector.broadcast %93 : vector<1x1x32xi1> to vector<8x8x32xi1>
    %95 = arith.select %94, %19, %24 : vector<8x8x32xi1>, vector<8x8x32xf32>
    %96 = vector.shape_cast %92 : vector<1x1x32xi1> to vector<1x1x32xi1>
    %97 = vector.broadcast %96 : vector<1x1x32xi1> to vector<8x8x32xi1>
    %98 = arith.select %97, %21, %25 : vector<8x8x32xi1>, vector<8x8x32xf32>
    "tpu.trace_start"() <{level = 10 : i32, message = "bqc,bkc->bqk"}> : () -> ()
    %cst_35 = arith.constant dense<0.000000e+00> : vector<8x8x8xf32>
    %99 = tpu.matmul %95, %20, %cst_35 {dimension_numbers = #tpu.dot_dimension_numbers<[2], [2], [1], [1], [0, 0, 0, 1, 1, 1], [0], [0]>} : vector<8x8x32xf32>, vector<8x8x32xf32>, vector<8x8x8xf32> -> vector<8x8x8xf32>
    "tpu.trace_stop"() : () -> ()
    %cst_36 = arith.constant dense<0xFF800000> : vector<8x8xf32>
    %100 = vector.multi_reduction <maximumf>, %99, %cst_36 [2] : vector<8x8x8xf32> to vector<8x8xf32>
    %101 = vector.shape_cast %100 : vector<8x8xf32> to vector<8x8x1xf32>
    %102 = vector.broadcast %101 : vector<8x8x1xf32> to vector<8x8x8xf32>
    %103 = arith.subf %99, %102 : vector<8x8x8xf32>
    %104 = math.exp %103 : vector<8x8x8xf32>
    %cst_37 = arith.constant dense<0.000000e+00> : vector<8x8xf32>
    %105 = vector.multi_reduction <add>, %104, %cst_37 [2] : vector<8x8x8xf32> to vector<8x8xf32>
    %106 = vector.shape_cast %105 : vector<8x8xf32> to vector<8x8x1xf32>
    %107 = tpu.reciprocal %106 {approx = true} : vector<8x8x1xf32> -> vector<8x8x1xf32>
    %108 = vector.broadcast %107 : vector<8x8x1xf32> to vector<8x8x8xf32>
    %109 = arith.mulf %104, %108 : vector<8x8x8xf32>
    "tpu.trace_start"() <{level = 10 : i32, message = "bqk,bkc->bqc"}> : () -> ()
    %cst_38 = arith.constant dense<0.000000e+00> : vector<8x8x32xf32>
    %110 = tpu.matmul %109, %98, %cst_38 {dimension_numbers = #tpu.dot_dimension_numbers<[2], [1], [1], [2], [0, 0, 0, 1, 1, 2], [0], [0]>} : vector<8x8x8xf32>, vector<8x8x32xf32>, vector<8x8x32xf32> -> vector<8x8x32xf32>
    "tpu.trace_stop"() : () -> ()
    %111 = arith.addf %82, %110 : vector<8x8x32xf32>
    %c24_i32_39 = arith.constant 24 : i32
    %112 = vector.broadcast %c24_i32_39 : i32 to vector<1x1x32xi32>
    %113 = arith.cmpi sge, %22, %112 : vector<1x1x32xi32>
    %c32_i32 = arith.constant 32 : i32
    %114 = vector.broadcast %c32_i32 : i32 to vector<1x1x32xi32>
    %115 = arith.cmpi slt, %22, %114 : vector<1x1x32xi32>
    %116 = arith.andi %113, %115 : vector<1x1x32xi1>
    %c24_i32_40 = arith.constant 24 : i32
    %117 = vector.broadcast %c24_i32_40 : i32 to vector<1x1x32xi32>
    %118 = arith.cmpi sge, %23, %117 : vector<1x1x32xi32>
    %c32_i32_41 = arith.constant 32 : i32
    %119 = vector.broadcast %c32_i32_41 : i32 to vector<1x1x32xi32>
    %120 = arith.cmpi slt, %23, %119 : vector<1x1x32xi32>
    %121 = arith.andi %118, %120 : vector<1x1x32xi1>
    %122 = vector.shape_cast %116 : vector<1x1x32xi1> to vector<1x1x32xi1>
    %123 = vector.broadcast %122 : vector<1x1x32xi1> to vector<8x8x32xi1>
    %124 = arith.select %123, %19, %24 : vector<8x8x32xi1>, vector<8x8x32xf32>
    %125 = vector.shape_cast %121 : vector<1x1x32xi1> to vector<1x1x32xi1>
    %126 = vector.broadcast %125 : vector<1x1x32xi1> to vector<8x8x32xi1>
    %127 = arith.select %126, %21, %25 : vector<8x8x32xi1>, vector<8x8x32xf32>
    "tpu.trace_start"() <{level = 10 : i32, message = "bqc,bkc->bqk"}> : () -> ()
    %cst_42 = arith.constant dense<0.000000e+00> : vector<8x8x8xf32>
    %128 = tpu.matmul %124, %20, %cst_42 {dimension_numbers = #tpu.dot_dimension_numbers<[2], [2], [1], [1], [0, 0, 0, 1, 1, 1], [0], [0]>} : vector<8x8x32xf32>, vector<8x8x32xf32>, vector<8x8x8xf32> -> vector<8x8x8xf32>
    "tpu.trace_stop"() : () -> ()
    %cst_43 = arith.constant dense<0xFF800000> : vector<8x8xf32>
    %129 = vector.multi_reduction <maximumf>, %128, %cst_43 [2] : vector<8x8x8xf32> to vector<8x8xf32>
    %130 = vector.shape_cast %129 : vector<8x8xf32> to vector<8x8x1xf32>
    %131 = vector.broadcast %130 : vector<8x8x1xf32> to vector<8x8x8xf32>
    %132 = arith.subf %128, %131 : vector<8x8x8xf32>
    %133 = math.exp %132 : vector<8x8x8xf32>
    %cst_44 = arith.constant dense<0.000000e+00> : vector<8x8xf32>
    %134 = vector.multi_reduction <add>, %133, %cst_44 [2] : vector<8x8x8xf32> to vector<8x8xf32>
    %135 = vector.shape_cast %134 : vector<8x8xf32> to vector<8x8x1xf32>
    %136 = tpu.reciprocal %135 {approx = true} : vector<8x8x1xf32> -> vector<8x8x1xf32>
    %137 = vector.broadcast %136 : vector<8x8x1xf32> to vector<8x8x8xf32>
    %138 = arith.mulf %133, %137 : vector<8x8x8xf32>
    "tpu.trace_start"() <{level = 10 : i32, message = "bqk,bkc->bqc"}> : () -> ()
    %cst_45 = arith.constant dense<0.000000e+00> : vector<8x8x32xf32>
    %139 = tpu.matmul %138, %127, %cst_45 {dimension_numbers = #tpu.dot_dimension_numbers<[2], [1], [1], [2], [0, 0, 0, 1, 1, 2], [0], [0]>} : vector<8x8x8xf32>, vector<8x8x32xf32>, vector<8x8x32xf32> -> vector<8x8x32xf32>
    "tpu.trace_stop"() : () -> ()
    %140 = arith.addf %111, %139 : vector<8x8x32xf32>
    %141 = vector.shape_cast %140 : vector<8x8x32xf32> to vector<64x32xf32>
    %c0_46 = arith.constant 0 : index
    %c0_47 = arith.constant 0 : index
    %142 = vector.load %arg8[%c0_46, %c0_47] : memref<32x32xf32, #tpu.memory_space<vmem>>, vector<32x32xf32>
    %cst_48 = arith.constant dense<0.000000e+00> : vector<64x32xf32>
    %143 = tpu.matmul %141, %142, %cst_48 {dimension_numbers = #tpu.dot_dimension_numbers<[1], [0], [0], [1], [0, 0, 1, 1], [], []>} : vector<64x32xf32>, vector<32x32xf32>, vector<64x32xf32> -> vector<64x32xf32>
    %c0_49 = arith.constant 0 : index
    %c0_50 = arith.constant 0 : index
    %144 = vector.load %arg9[%c0_49, %c0_50] : memref<1x32xf32, #tpu.memory_space<vmem>>, vector<1x32xf32>
    %145 = vector.broadcast %144 : vector<1x32xf32> to vector<64x32xf32>
    %146 = arith.addf %143, %145 : vector<64x32xf32>
    %147 = vector.shape_cast %146 : vector<64x32xf32> to vector<8x8x32xf32>
    %c0_51 = arith.constant 0 : index
    %c0_52 = arith.constant 0 : index
    %c0_53 = arith.constant 0 : index
    %148 = vector.load %arg10[%c0_51, %c0_52, %c0_53] : memref<8x8x32xf32, #tpu.memory_space<vmem>>, vector<8x8x32xf32>
    tpu.vector_store %arg10[%c0_51, %c0_52, %c0_53], %147 {strides = array<i32>} : memref<8x8x32xf32, #tpu.memory_space<vmem>>, vector<8x8x32xf32>,
    return
  }
  func.func @transform_0(%arg0: i32) -> (i32, i32, i32) {
    %c0_i32 = arith.constant 0 : i32
    %c0_i32_0 = arith.constant 0 : i32
    %c0_i32_1 = arith.constant 0 : i32
    return %arg0, %c0_i32, %c0_i32_0 : i32, i32, i32
  }
  func.func @transform_1(%arg0: i32) -> (i32, i32) {
    %c0_i32 = arith.constant 0 : i32
    %c0_i32_0 = arith.constant 0 : i32
    %c0_i32_1 = arith.constant 0 : i32
    return %c0_i32, %c0_i32_0 : i32, i32
  }
  func.func @transform_2(%arg0: i32) -> (i32, i32) {
    %c0_i32 = arith.constant 0 : i32
    %c0_i32_0 = arith.constant 0 : i32
    %c0_i32_1 = arith.constant 0 : i32
    return %c0_i32, %c0_i32_0 : i32, i32
  }
  func.func @transform_3(%arg0: i32) -> (i32, i32) {
    %c0_i32 = arith.constant 0 : i32
    %c0_i32_0 = arith.constant 0 : i32
    %c0_i32_1 = arith.constant 0 : i32
    return %c0_i32, %c0_i32_0 : i32, i32
  }
  func.func @transform_4(%arg0: i32) -> (i32, i32) {
    %c0_i32 = arith.constant 0 : i32
    %c0_i32_0 = arith.constant 0 : i32
    %c0_i32_1 = arith.constant 0 : i32
    return %c0_i32, %c0_i32_0 : i32, i32
  }
  func.func @transform_5(%arg0: i32) -> (i32, i32) {
    %c0_i32 = arith.constant 0 : i32
    %c0_i32_0 = arith.constant 0 : i32
    %c0_i32_1 = arith.constant 0 : i32
    return %c0_i32, %c0_i32_0 : i32, i32
  }
  func.func @transform_6(%arg0: i32) -> (i32, i32) {
    %c0_i32 = arith.constant 0 : i32
    %c0_i32_0 = arith.constant 0 : i32
    %c0_i32_1 = arith.constant 0 : i32
    return %c0_i32, %c0_i32_0 : i32, i32
  }
  func.func @transform_7(%arg0: i32) -> (i32, i32) {
    %c0_i32 = arith.constant 0 : i32
    %c0_i32_0 = arith.constant 0 : i32
    %c0_i32_1 = arith.constant 0 : i32
    return %c0_i32, %c0_i32_0 : i32, i32
  }
  func.func @transform_8(%arg0: i32) -> (i32, i32) {
    %c0_i32 = arith.constant 0 : i32
    %c0_i32_0 = arith.constant 0 : i32
    %c0_i32_1 = arith.constant 0 : i32
    return %c0_i32, %c0_i32_0 : i32, i32
  }
  func.func @transform_9(%arg0: i32) -> (i32, i32, i32) {
    %c0_i32 = arith.constant 0 : i32
    %c0_i32_0 = arith.constant 0 : i32
    %c0_i32_1 = arith.constant 0 : i32
    return %arg0, %c0_i32, %c0_i32_0 : i32, i32, i32
  }
}

</mosaic_0001>

<bundles_post_ra>
// kernel: tpu_custom_call.1
= control target key start
LH: loop header
LB: loop body
LE: loop exit
PB: predicated region body
PF: predicated region fallthrough
CT: control target
= control target key end

     0   :  { %14 = vsyncpa [#allocation3], 0  ;;  %s3647_s0 = inlined_call_operand.hbm [shape: f32[8,8,32], index: 0, kind: input, shape index: {}]   ;;  %s3648_s1 = inlined_call_operand.hbm [shape: f32[32,32], index: 1, kind: input, shape index: {}]   ;;  %s3649_s2 = inlined_call_operand.vmem [shape: f32[1,32], index: 2, kind: input, shape index: {}]   ;;  %s3650_s3 = inlined_call_operand.hbm [shape: f32[32,32], index: 3, kind: input, shape index: {}]   ;;  %s3651_s4 = inlined_call_operand.vmem [shape: f32[1,32], index: 4, kind: input, shape index: {}]   ;;  %s3652_s5 = inlined_call_operand.hbm [shape: f32[32,32], index: 5, kind: input, shape index: {}]   ;;  %s3653_s6 = inlined_call_operand.vmem [shape: f32[1,32], index: 6, kind: input, shape index: {}]   ;;  %s3654_s7 = inlined_call_operand.hbm [shape: f32[32,32], index: 7, kind: input, shape index: {}]   ;;  %s3655_s8 = inlined_call_operand.vmem [shape: f32[1,32], index: 8, kind: input, shape index: {}]   ;;  %s3656_s9 = inlined_call_operand.hbm [shape: f32[8,8,32], index: 9, kind: output, shape index: {}]  }
   0x1   :  { %15 = vsyncpa [#allocation6], 0 }
   0x2   :  { %16 = vsyncpa [#allocation9], 0 }
   0x3   :  { %17 = vsyncpa [#allocation4], 0  ;;  %s35_s11 = sshll.u32 %s3648_s1, 4  ;;  %s2816_s12 = smov [#allocation5]   ;;  %s36_s11 = int_to_ptr.hbm [resolvable:$true] %s35_s11 }
   0x4   :  { %s37_s13 = sshll.u32 %s2816_s12, 4  ;;  %s65_s16 = sshll.u32 %s3652_s5, 4  ;;  %s38_s13 = int_to_ptr.vmem [resolvable:$true] %s37_s13  ;;  %s66_s16 = int_to_ptr.hbm [resolvable:$true] %s65_s16 }
   0x5   :  { %s2817_s17 = smov 128   ;;  %s2818_s18 = smov 8  }
   0x6   :  { %43 = dma.hbm_to_vmem [thread:$0]  %s36_s11, 512, %s38_s13, [#allocation6], %s2817_s17, %s2817_s17, %s2818_s18  }
   0x7   :  { %s2819_s19 = smov [#allocation8]   ;;  %s22_s1 = sshll.u32 %s3647_s0, 4  ;;  %s23_s1 = int_to_ptr.hbm [resolvable:$true] %s22_s1 }
   0x8   :  { %s67_s20 = sshll.u32 %s2819_s19, 4  ;;  %s50_s24 = sshll.u32 %s3650_s3, 4  ;;  %s68_s20 = int_to_ptr.vmem [resolvable:$true] %s67_s20  ;;  %s51_s24 = int_to_ptr.hbm [resolvable:$true] %s50_s24 }
   0x9   :  { %73 = dma.hbm_to_vmem [thread:$0]  %s66_s16, 512, %s68_s20, [#allocation9], %s2817_s17, %s2817_s17, %s2818_s18  }
   0xa   :  { %s2820_s25 = smov [#allocation2]   ;;  %s2821_s27 = smov [#allocation7]  }
   0xb   :  { %s24_s26 = sshll.u32 %s2820_s25, 4  ;;  %s52_s0 = sshll.u32 %s2821_s27, 4  ;;  %s25_s26 = int_to_ptr.vmem [resolvable:$true] %s24_s26  ;;  %s53_s0 = int_to_ptr.vmem [resolvable:$true] %s52_s0 }
   0xc   :  { %30 = dma.hbm_to_vmem [thread:$0]  %s23_s1, 1024, %s25_s26, [#allocation3], %s2817_s17, %s2817_s17, %s2818_s18  }
   0xd   :  { %s80_s30 = sshll.u32 %s3654_s7, 4  ;;  %s2822_s3 = smov [#allocation10]   ;;  %s81_s30 = int_to_ptr.hbm [resolvable:$true] %s80_s30 }
   0xe   :  { %58 = dma.hbm_to_vmem [thread:$0]  %s51_s24, 512, %s53_s0, [#allocation6], %s2817_s17, %s2817_s17, %s2818_s18  }
   0xf   :  { %s82_s10 = sshll.u32 %s2822_s3, 4  ;;  %s83_s10 = int_to_ptr.vmem [resolvable:$true] %s82_s10 }
  0x10   :  { %88 = dma.hbm_to_vmem [thread:$0]  %s81_s30, 512, %s83_s10, [#allocation9], %s2817_s17, %s2817_s17, %s2818_s18  }
  0x11   :  { %2808 = dma.done.wait [#allocation3], 1024  }
  0x12   :  { %2809 = vsyncadd [#allocation3], 4294966272 }
  0x13   :  { %2810 = dma.done.wait [#allocation6], 1024  }
  0x14   :  { %2811 = vsyncadd [#allocation6], 4294966272 }
  0x15   :  { %2812 = dma.done.wait [#allocation9], 1024  }
  0x16   :  { %2813 = vsyncadd [#allocation9], 4294966272  ;;  %v122_v0 = vld [vmem:[#allocation5 + $0x18] sm:$0xff]  ;;  %v121_v1 = vld [vmem:[#allocation5 + $0x10] sm:$0xff]  ;;  %vm127_vm0 = vcmask 261120   ;;  %v299_v20 = vlaneseq  ;;  %vm530_vm11 = vcmask 64512  }
  0x17   :  { %2512 = vmatpush.msra.mxu1 %v122_v0  ;;  %164 = vmatpush.msra.mxu0 %v122_v0  ;;  %v120_v2 = vld [vmem:[#allocation5 + $0x8] sm:$0xff]  ;;  %v119_v3 = vld [vmem:[#allocation5] sm:$0xff]  ;;  %v204_v6 = vld [vmem:[#allocation7 + $0x18] sm:$0xff]  ;;  %s2337_s20 = sshll.u32 %s3656_s9, 4  ;;  %s2338_s20 = int_to_ptr.hbm [resolvable:$true] %s2337_s20 }
  0x18   :  { %2513 = vmatpush.msra.mxu2 %v122_v0  ;;  %v116_v4 = vld [vmem:[#allocation2 + $0x28] sm:$0xff]  ;;  %v111_v5 = vld [vmem:[#allocation2] sm:$0xff]  ;;  %v203_v7 = vld [vmem:[#allocation7 + $0x10] sm:$0xff]  ;;  %v2928_v21 = vand.u32 127, %v299_v20 }
  0x19   :  { %2514 = vmatpush.msra.mxu1 %v121_v1  ;;  %165 = vmatpush.msra.mxu0 %v121_v1  ;;  %v202_v8 = vld [vmem:[#allocation7 + $0x8] sm:$0xff]  ;;  %v201_v9 = vld [vmem:[#allocation7] sm:$0xff]  ;;  %v113_v11 = vld [vmem:[#allocation2 + $0x10] sm:$0xff] }
  0x1a   :  { %2515 = vmatpush.msra.mxu2 %v121_v1  ;;  %v112_v10 = vld [vmem:[#allocation2 + $0x8] sm:$0xff]  ;;  %v117_v12 = vld [vmem:[#allocation2 + $0x30] sm:$0xff]  ;;  %v114_v13 = vld [vmem:[#allocation2 + $0x18] sm:$0xff]  ;;  %vm1280_vm1 = vcmp.ge.s32.totalorder %v2928_v21, 16  ;;  %vm1281_vm2 = vcmp.lt.s32.totalorder %v2928_v21, 24  ;;  %vm1765_vm3 = vcmp.ge.s32.totalorder %v2928_v21, 24 }
  0x1b   :  { %2516 = vmatpush.msra.mxu1 %v120_v2  ;;  %166 = vmatpush.msra.mxu0 %v120_v2  ;;  %v118_v14 = vld [vmem:[#allocation2 + $0x38] sm:$0xff]  ;;  %v115_v15 = vld [vmem:[#allocation2 + $0x20] sm:$0xff]  ;;  %v252_v17 = vld [vmem:[#allocation8 + $0x10] sm:$0xff]  ;;  %vm1766_vm4 = vcmp.lt.s32.totalorder %v2928_v21, 32  ;;  %vm302_vm7 = vcmp.lt.s32.totalorder %v2928_v21, 8  ;;  %vm619_vm8 = vcmp.ge.s32.totalorder %v2928_v21, 8 }
  0x1c   :  { %2517 = vmatpush.msra.mxu2 %v120_v2  ;;  %v253_v16 = vld [vmem:[#allocation8 + $0x18] sm:$0xff]  ;;  %v251_v18 = vld [vmem:[#allocation8 + $0x8] sm:$0xff]  ;;  %v250_v19 = vld [vmem:[#allocation8] sm:$0xff]  ;;  %vm620_vm9 = vcmp.lt.s32.totalorder %v2928_v21, 16 }
  0x1d   :  { %2518 = vmatpush.msra.mxu1 %v119_v3  ;;  %167 = vmatpush.msra.mxu0 %v119_v3  ;;  %v2933_v22 = vld [vmem:[%s3649_s2] ss:$0 sm:$0xff]  ;;  %vm2941_vm5 = vmand %vm1280_vm1, %vm1281_vm2 }
  0x1e   :  { %2357 = vmatmul.msk.f32.vlgmr.msra.gmra.mxu1 %vm127_vm0, %v116_v4  ;;  %2352 = vmatmul.msk.f32.vlgmr.msra.gmra.mxu0 %vm127_vm0, %v111_v5  ;;  %vm2949_vm6 = vmand %vm1765_vm3, %vm1766_vm4  ;;  %v2956_v31 = vld [vmem:[%s3651_s4] ss:$0 sm:$0xff] }
  0x1f   :  { %221 = vmatpush.msrb.mxu1 %v204_v6  ;;  %2519 = vmatpush.msra.mxu2 %v119_v3  ;;  %vm2995_vm10 = vmand %vm619_vm8, %vm620_vm9 }
  0x20   :  { %2358 = vmatmul.msk.f32.vlgmr.msra.gmra.mxu2 %vm127_vm0, %v117_v12 }
  0x21   :  { %222 = vmatpush.msrb.mxu1 %v203_v7  ;;  %270 = vmatpush.msrb.mxu2 %v253_v16 }
  0x23   :  { %223 = vmatpush.msrb.mxu1 %v202_v8  ;;  %271 = vmatpush.msrb.mxu2 %v252_v17 }
  0x25   :  { %224 = vmatpush.msrb.mxu1 %v201_v9  ;;  %272 = vmatpush.msrb.mxu2 %v251_v18 }
  0x26   :  { %2360 = vmatmul.msk.f32.vlgmr.msrb.gmra.mxu1 %vm127_vm0, %v111_v5  ;;  %2353 = vmatmul.msk.f32.gmra.mxu0 %vm127_vm0, %v112_v10 }
  0x27   :  { %273 = vmatpush.msrb.mxu2 %v250_v19 }
  0x28   :  { %2359 = vmatmul.msk.f32.gmra.mxu2 %vm127_vm0, %v118_v14 }
  0x2e   :  { %2361 = vmatmul.msk.f32.gmra.mxu1 %vm127_vm0, %v112_v10  ;;  %2354 = vmatmul.msk.f32.gmra.mxu0 %vm127_vm0, %v113_v11 }
  0x30   :  { %2368 = vmatmul.msk.f32.vlgmr.msrb.gmra.mxu2 %vm127_vm0, %v111_v5 }
  0x36   :  { %2362 = vmatmul.msk.f32.gmra.mxu1 %vm127_vm0, %v113_v11  ;;  %2355 = vmatmul.msk.f32.gmra.mxu0 %vm127_vm0, %v114_v13 }
  0x38   :  { %2369 = vmatmul.msk.f32.gmra.mxu2 %vm127_vm0, %v112_v10 }
  0x3e   :  { %2363 = vmatmul.msk.f32.gmra.mxu1 %vm127_vm0, %v114_v13  ;;  %2356 = vmatmul.msk.f32.gmra.mxu0 %vm127_vm0, %v115_v15 }
  0x40   :  { %2370 = vmatmul.msk.f32.gmra.mxu2 %vm127_vm0, %v113_v11 }
  0x46   :  { %2364 = vmatmul.msk.f32.gmra.mxu1 %vm127_vm0, %v115_v15 }
  0x48   :  { %2371 = vmatmul.msk.f32.gmra.mxu2 %vm127_vm0, %v114_v13 }
  0x4e   :  { %2365 = vmatmul.msk.f32.gmra.mxu1 %vm127_vm0, %v116_v4 }
  0x50   :  { %2372 = vmatmul.msk.f32.gmra.mxu2 %vm127_vm0, %v115_v15 }
  0x56   :  { %2366 = vmatmul.msk.f32.gmra.mxu1 %vm127_vm0, %v117_v12 }
  0x58   :  { %2373 = vmatmul.msk.f32.gmra.mxu2 %vm127_vm0, %v116_v4 }
  0x5e   :  { %2367 = vmatmul.msk.f32.gmra.mxu1 %vm127_vm0, %v118_v14 }
  0x60   :  { %2374 = vmatmul.msk.f32.gmra.mxu2 %vm127_vm0, %v117_v12 }
  0x68   :  { %2375 = vmatmul.msk.f32.gmra.mxu2 %vm127_vm0, %v118_v14 }
  0x9b   :  { %v184_v23 = vpop.f32.mrf.mxu1  ;;  %v169_v24 = vpop.f32.mrf.mxu0 }
  0x9c   :  { %v185_v25 = vadd.f32 %v2933_v22, %v184_v23  ;;  %v170_v26 = vadd.f32 %v2933_v22, %v169_v24 }
  0x9e   :  { %v2945_v28 = vmul.f32 0.35355338, %v185_v25  ;;  %v2947_v29 = vmul.f32 0.35355338, %v170_v26 }
  0xa0   :  { %v1285_v32 = vsel %vm2941_vm5, %v2947_v29, 0.0  ;;  %v1290_v33 = vsel %vm2941_vm5, %v2945_v28, 0.0  ;;  %v306_v40 = vsel %vm302_vm7, %v2947_v29, 0.0  ;;  %v311_v24 = vsel %vm302_vm7, %v2945_v28, 0.0 }
  0xa1   :  { %v629_v25 = vsel %vm2995_vm10, %v2945_v28, 0.0 }
  0xa3   :  { %v226_v36 = vpop.f32.mrf.mxu1  ;;  %v172_v37 = vpop.f32.mrf.mxu0 }
  0xa4   :  { %v2971_v38 = vadd.f32 %v2956_v31, %v226_v36  ;;  %v173_v39 = vadd.f32 %v2933_v22, %v172_v37  ;;  %v187_v54 = vpop.f32.mrf.mxu2 }
  0xa5   :  { %v188_v57 = vadd.f32 %v2933_v22, %v187_v54 }
  0xa6   :  { %2376 = vmatpush.xpose.msk.msra.mxu1 %vm127_vm0, %v2971_v38  ;;  %v2980_v41 = vmul.f32 0.35355338, %v173_v39 }
  0xa7   :  { %v3036_v63 = vmul.f32 0.35355338, %v188_v57 }
  0xa8   :  { %v1286_v42 = vsel %vm2941_vm5, %v2980_v41, 0.0  ;;  %v307_v49 = vsel %vm302_vm7, %v2980_v41, 0.0  ;;  %v625_v50 = vsel %vm2995_vm10, %v2980_v41, 0.0 }
  0xa9   :  { %2377 = vmatmul.msk.f32.vlgmr.msra.gmra.mxu1 %vm127_vm0, %v306_v40  ;;  %v1291_v6 = vsel %vm2941_vm5, %v3036_v63, 0.0  ;;  %v312_v39 = vsel %vm302_vm7, %v3036_v63, 0.0  ;;  %v630_v40 = vsel %vm2995_vm10, %v3036_v63, 0.0 }
  0xab   :  { %v229_v44 = vpop.f32.mrf.mxu1  ;;  %v175_v45 = vpop.f32.mrf.mxu0 }
  0xac   :  { %v2992_v46 = vadd.f32 %v2956_v31, %v229_v44  ;;  %v176_v47 = vadd.f32 %v2933_v22, %v175_v45  ;;  %v190_v2 = vpop.f32.mrf.mxu2  ;;  %v2534_v44 = vld [vmem:[%s3653_s6] ss:$0 sm:$0xff] }
  0xad   :  { %v191_v5 = vadd.f32 %v2933_v22, %v190_v2 }
  0xae   :  { %2378 = vmatpush.xpose.msk.msra.mxu3 %vm127_vm0, %v2992_v46  ;;  %2394 = vmatpush.xpose.msk.msrb.mxu0 %vm127_vm0, %v2992_v46  ;;  %v3009_v51 = vmul.f32 0.35355338, %v176_v47 }
  0xaf   :  { %v3069_v13 = vmul.f32 0.35355338, %v191_v5 }
  0xb0   :  { %v1287_v52 = vsel %vm2941_vm5, %v3009_v51, 0.0  ;;  %v308_v60 = vsel %vm302_vm7, %v3009_v51, 0.0  ;;  %v626_v62 = vsel %vm2995_vm10, %v3009_v51, 0.0 }
  0xb1   :  { %2379 = vmatmul.msk.f32.vlgmr.msra.gmra.mxu3 %vm127_vm0, %v307_v49  ;;  %2395 = vmatmul.msk.f32.vlgmr.msrb.gmra.mxu0 %vm127_vm0, %v625_v50  ;;  %v1292_v17 = vsel %vm2941_vm5, %v3069_v13, 0.0  ;;  %v313_v54 = vsel %vm302_vm7, %v3069_v13, 0.0 }
  0xb3   :  { %v232_v55 = vpop.f32.mrf.mxu1  ;;  %v178_v56 = vpop.f32.mrf.mxu0 }
  0xb4   :  { %v3021_v58 = vadd.f32 %v2956_v31, %v232_v55  ;;  %v179_v59 = vadd.f32 %v2933_v22, %v178_v56  ;;  %v275_v26 = vpop.f32.mrf.mxu2  ;;  %v631_v55 = vsel %vm2995_vm10, %v3069_v13, 0.0 }
  0xb5   :  { %v3156_v57 = vadd.f32 %v2534_v44, %v275_v26 }
  0xb6   :  { %2380 = vmatpush.xpose.msk.msrb.mxu3 %vm127_vm0, %v3021_v58  ;;  %2396 = vmatpush.xpose.msk.msrb.mxu1 %vm127_vm0, %v3021_v58  ;;  %v3031_v61 = vmul.f32 0.35355338, %v179_v59  ;;  %v624_v59 = vsel %vm2995_vm10, %v2947_v29, 0.0 }
  0xb8   :  { %v1288_v0 = vsel %vm2941_vm5, %v3031_v61, 0.0  ;;  %v309_v10 = vsel %vm302_vm7, %v3031_v61, 0.0  ;;  %v627_v11 = vsel %vm2995_vm10, %v3031_v61, 0.0 }
  0xb9   :  { %2381 = vmatmul.msk.f32.vlgmr.msrb.gmra.mxu3 %vm127_vm0, %v308_v60  ;;  %2397 = vmatmul.msk.f32.vlgmr.msrb.gmra.mxu1 %vm127_vm0, %v626_v62 }
  0xbb   :  { %v235_v3 = vpop.f32.mrf.mxu1  ;;  %v181_v4 = vpop.f32.mrf.mxu0 }
  0xbc   :  { %v3051_v7 = vadd.f32 %v2956_v31, %v235_v3  ;;  %v182_v8 = vadd.f32 %v2933_v22, %v181_v4  ;;  %v278_v45 = vpop.f32.mrf.mxu2 }
  0xbd   :  { %v3127_v47 = vadd.f32 %v2534_v44, %v278_v45 }
  0xbe   :  { %2382 = vmatpush.xpose.msk.msra.mxu3 %vm127_vm0, %v3051_v7  ;;  %2398 = vmatpush.xpose.msk.msra.mxu2 %vm127_vm0, %v3051_v7  ;;  %v3067_v12 = vmul.f32 0.35355338, %v182_v8 }
  0xc0   :  { %v1289_v14 = vsel %vm2941_vm5, %v3067_v12, 0.0  ;;  %v310_v20 = vsel %vm302_vm7, %v3067_v12, 0.0  ;;  %v628_v2 = vsel %vm2995_vm10, %v3067_v12, 0.0 }
  0xc1   :  { %2383 = vmatmul.msk.f32.vlgmr.msra.gmra.mxu3 %vm127_vm0, %v309_v10  ;;  %2399 = vmatmul.msk.f32.vlgmr.msra.gmra.mxu2 %vm127_vm0, %v627_v11 }
  0xc3   :  { %v238_v16 = vpop.f32.mrf.mxu1 }
  0xc4   :  { %v3083_v18 = vadd.f32 %v2956_v31, %v238_v16 }
  0xc6   :  { %2384 = vmatpush.xpose.msk.msrb.mxu3 %vm127_vm0, %v3083_v18 }
  0xc9   :  { %2385 = vmatmul.msk.f32.vlgmr.msrb.gmra.mxu3 %vm127_vm0, %v310_v20 }
  0xcb   :  { %v241_v22 = vpop.f32.mrf.mxu1 }
  0xcc   :  { %v3095_v23 = vadd.f32 %v2956_v31, %v241_v22 }
  0xce   :  { %2386 = vmatpush.xpose.msk.msra.mxu3 %vm127_vm0, %v3095_v23  ;;  %2402 = vmatpush.xpose.msk.msra.mxu0 %vm127_vm0, %v3095_v23 }
  0xd1   :  { %2387 = vmatmul.msk.f32.vlgmr.msra.gmra.mxu3 %vm127_vm0, %v311_v24  ;;  %2403 = vmatmul.msk.f32.vlgmr.msra.gmra.mxu0 %vm127_vm0, %v629_v25 }
  0xd2   :  { %2410 = vmatpush.msk.msrb.mxu0 %vm2995_vm10, %v3127_v47 }
  0xd3   :  { %v244_v36 = vpop.f32.mrf.mxu1 }
  0xd4   :  { %v3110_v37 = vadd.f32 %v2956_v31, %v244_v36 }
  0xd6   :  { %2388 = vmatpush.xpose.msk.msrb.mxu3 %vm127_vm0, %v3110_v37  ;;  %2404 = vmatpush.xpose.msk.msra.mxu1 %vm127_vm0, %v3110_v37 }
  0xd9   :  { %2389 = vmatmul.msk.f32.vlgmr.msrb.gmra.mxu3 %vm127_vm0, %v312_v39  ;;  %2405 = vmatmul.msk.f32.vlgmr.msra.gmra.mxu1 %vm127_vm0, %v630_v40 }
  0xdb   :  { %v247_v49 = vpop.f32.mrf.mxu1 }
  0xdc   :  { %v3130_v50 = vadd.f32 %v2956_v31, %v247_v49  ;;  %v281_v31 = vpop.f32.mrf.mxu2 }
  0xdd   :  { %v3151_v56 = vadd.f32 %v2534_v44, %v281_v31 }
  0xde   :  { %2390 = vmatpush.xpose.msk.msra.mxu3 %vm127_vm0, %v3130_v50  ;;  %2406 = vmatpush.xpose.msk.msrb.mxu2 %vm127_vm0, %v3130_v50 }
  0xdf   :  { %2412 = vmatpush.msk.msrb.mxu1 %vm2995_vm10, %v3151_v56 }
  0xe1   :  { %2391 = vmatmul.msk.f32.vlgmr.msra.gmra.mxu3 %vm127_vm0, %v313_v54  ;;  %2407 = vmatmul.msk.f32.vlgmr.msrb.gmra.mxu2 %vm127_vm0, %v631_v55 }
  0xe2   :  { %2392 = vmatpush.xpose.msk.msrb.mxu3 %vm127_vm0, %v2971_v38 }
  0xe4   :  { %v284_v60 = vpop.f32.mrf.mxu2 }
  0xe5   :  { %v3162_v62 = vadd.f32 %v2534_v44, %v284_v60 }
  0xe6   :  { %2400 = vmatpush.xpose.msk.msra.mxu3 %vm127_vm0, %v3083_v18 }
  0xe7   :  { %2414 = vmatpush.msk.msra.mxu2 %vm2995_vm10, %v3162_v62 }
  0xe9   :  { %2393 = vmatmul.msk.f32.vlgmr.msrb.gmra.mxu3 %vm127_vm0, %v624_v59 }
  0xea   :  { %2408 = vmatpush.msk.msrb.mxu3 %vm2995_vm10, %v3156_v57 }
  0xec   :  { %v287_v3 = vpop.f32.mrf.mxu2 }
  0xed   :  { %v3174_v4 = vadd.f32 %v2534_v44, %v287_v3 }
  0xf1   :  { %2401 = vmatmul.msk.f32.vlgmr.msra.gmra.mxu3 %vm127_vm0, %v628_v2 }
  0xf2   :  { %2416 = vmatpush.msk.msra.mxu3 %vm2995_vm10, %v3174_v4 }
  0xf4   :  { %v290_v5 = vpop.f32.mrf.mxu2 }
  0xf5   :  { %v3179_v8 = vadd.f32 %v2534_v44, %v290_v5 }
  0xf7   :  { %2418 = vmatpush.msk.msra.mxu0 %vm2995_vm10, %v3179_v8 }
  0xfc   :  { %v293_v10 = vpop.f32.mrf.mxu2 }
  0xfd   :  { %v3184_v11 = vadd.f32 %v2534_v44, %v293_v10 }
  0xff   :  { %2420 = vmatpush.msk.msra.mxu1 %vm2995_vm10, %v3184_v11 }
 0x104   :  { %v296_v16 = vpop.f32.mrf.mxu2 }
 0x105   :  { %v3189_v20 = vadd.f32 %v2534_v44, %v296_v16 }
 0x107   :  { %2422 = vmatpush.msk.msrb.mxu2 %vm2995_vm10, %v3189_v20 }
 0x126   :  { %v345_v22 = vpop.f32.mrf.mxu1 }
 0x127   :  { %v531_v24 = vsel %vm530_vm11, %v345_v22, -inf }
 0x128   :  { %532 = vmax.xlane.f32.xlu1 %v531_v24 }
 0x12e   :  { %v3195_v25 = vpop.f32.mrf.mxu0 }
 0x12f   :  { %v827_v26 = vsel %vm530_vm11, %v3195_v25, -inf }
 0x130   :  { %828 = vmax.xlane.f32.xlu2 %v827_v26 }
 0x134   :  { %v3199_v36 = vpop.f32.mrf.mxu3 }
 0x135   :  { %v534_v2 = vsel %vm530_vm11, %v3199_v36, -inf }
 0x136   :  { %v3209_v45 = vpop.f32.mrf.mxu1 }
 0x137   :  { %v830_v55 = vsel %vm530_vm11, %v3209_v45, -inf }
 0x13c   :  { %v3201_v39 = vpop.f32.mrf.mxu3 }
 0x13d   :  { %v537_v16 = vsel %vm530_vm11, %v3201_v39, -inf }
 0x144   :  { %v3203_v40 = vpop.f32.mrf.mxu3  ;;  %v3205_v44 = vpop.f32.mrf.mxu2 }
 0x145   :  { %v833_v48 = vsel %vm530_vm11, %v3205_v44, -inf }
 0x146   :  { %834 = vmax.xlane.f32.xlu1 %v833_v48 }
 0x14c   :  { %v449_v49 = vpop.f32.mrf.mxu3 }
 0x14d   :  { %v543_v54 = vsel %vm530_vm11, %v449_v49, -inf }
 0x14e   :  { %544 = vmax.xlane.f32.xlu2 %v543_v54  ;;  %831 = vmax.xlane.f32.xlu1 %v830_v55  ;;  %v775_v31 = vpop.f32.mrf.mxu0 }
 0x14f   :  { %v839_v60 = vsel %vm530_vm11, %v775_v31, -inf }
 0x154   :  { %v475_v59 = vpop.f32.mrf.mxu3 }
 0x155   :  { %v546_v26 = vsel %vm530_vm11, %v475_v59, -inf }
 0x156   :  { %840 = vmax.xlane.f32.xlu2 %v839_v60  ;;  %535 = vmax.xlane.f32.xlu1 %v534_v2  ;;  %v798_v3 = vpop.f32.mrf.mxu1 }
 0x157   :  { %v842_v10 = vsel %vm530_vm11, %v798_v3, -inf }
 0x15c   :  { %v3217_v5 = vpop.f32.mrf.mxu3 }
 0x15e   :  { %843 = vmax.xlane.f32.xlu2 %v842_v10  ;;  %538 = vmax.xlane.f32.xlu1 %v537_v16  ;;  %v540_v10 = vsel %vm530_vm11, %v3203_v40, -inf }
 0x164   :  { %v3222_v24 = vpop.f32.mrf.mxu3  ;;  %v3227_v2 = vpop.f32.mrf.mxu2 }
 0x165   :  { %v845_v9 = vsel %vm530_vm11, %v3227_v2, -inf  ;;  %v552_v16 = vsel %vm530_vm11, %v3222_v24, -inf }
 0x166   :  { %547 = vmax.xlane.f32.xlu2 %v546_v26  ;;  %v549_v26 = vsel %vm530_vm11, %v3217_v5, -inf }
 0x16c   :  { %v660_v48 = vpop.f32.mrf.mxu3 }
 0x16d   :  { %v824_v54 = vsel %vm530_vm11, %v660_v48, -inf }
 0x16e   :  { %825 = vmax.xlane.f32.xlu0 %v824_v54 }
 0x174   :  { %v752_v55 = vpop.f32.mrf.mxu3 }
 0x175   :  { %v836_v60 = vsel %vm530_vm11, %v752_v55, -inf }
 0x176   :  { %837 = vmax.xlane.f32.xlu0 %v836_v60 }
 0x17e   :  { %846 = vmax.xlane.f32.xlu0 %v845_v9 }
 0x186   :  { %541 = vmax.xlane.f32.xlu0 %v540_v10 }
 0x18e   :  { %553 = vmax.xlane.f32.xlu0 %v552_v16 }
 0x196   :  { %550 = vmax.xlane.f32.xlu0 %v549_v26 }
 0x19b   :  { %v533_v54 = vpop.xlane.xlu1 %532 }
 0x19c   :  { %v555_v60 = vsub.f32 %v345_v22, %v533_v54 }
 0x19e   :  { %v563_v35 = vmul.f32 1.442695, %v555_v60 }
 0x1a0   :  { %2536 = vpow2.f32 %v563_v35 }
 0x1a3   :  { %v829_v19 = vpop.xlane.xlu2 %828 }
 0x1a6   :  { %v3237_v53 = vpop.eup %2536 }
 0x1a7   :  { %v579_v9 = vsel %vm530_vm11, %v3237_v53, 0.0 }
 0x1a8   :  { %580 = vadd.xlane.f32.xlu0 %v579_v9 }
 0x1c1   :  { %v545_v10 = vpop.xlane.xlu2 %544 }
 0x1c2   :  { %v559_v43 = vsub.f32 %v449_v49, %v545_v10 }
 0x1c4   :  { %v571_v1 = vmul.f32 1.442695, %v559_v43 }
 0x1c6   :  { %2538 = vpow2.f32 %v571_v1 }
 0x1c9   :  { %v841_v16 = vpop.xlane.xlu2 %840 }
 0x1ca   :  { %v853_v15 = vsub.f32 %v775_v31, %v841_v16  ;;  %v835_v16 = vpop.xlane.xlu1 %834 }
 0x1cc   :  { %v3241_v34 = vpop.eup %2538  ;;  %v866_v26 = vmul.f32 1.442695, %v853_v15 }
 0x1cd   :  { %v591_v22 = vsel %vm530_vm11, %v3241_v34, 0.0 }
 0x1ce   :  { %2540 = vpow2.f32 %v866_v26  ;;  %592 = vadd.xlane.f32.xlu0 %v591_v22 }
 0x1d1   :  { %v844_v35 = vpop.xlane.xlu2 %843 }
 0x1d2   :  { %v854_v54 = vsub.f32 %v798_v3, %v844_v35  ;;  %v851_v35 = vsub.f32 %v3205_v44, %v835_v16 }
 0x1d4   :  { %v3245_v60 = vpop.eup %2540  ;;  %v868_v9 = vmul.f32 1.442695, %v854_v54 }
 0x1d5   :  { %v887_v49 = vsel %vm530_vm11, %v3245_v60, 0.0 }
 0x1d6   :  { %2542 = vpow2.f32 %v868_v9  ;;  %888 = vadd.xlane.f32.xlu0 %v887_v49 }
 0x1d9   :  { %v548_v43 = vpop.xlane.xlu2 %547 }
 0x1da   :  { %v560_v1 = vsub.f32 %v475_v59, %v548_v43  ;;  %v862_v59 = vmul.f32 1.442695, %v851_v35 }
 0x1dc   :  { %v3249_v31 = vpop.eup %2542  ;;  %v573_v15 = vmul.f32 1.442695, %v560_v1 }
 0x1dd   :  { %v890_v10 = vsel %vm530_vm11, %v3249_v31, 0.0 }
 0x1de   :  { %2544 = vpow2.f32 %v573_v15  ;;  %891 = vadd.xlane.f32.xlu0 %v890_v10  ;;  %v849_v15 = vsub.f32 %v3195_v25, %v829_v19 }
 0x1e0   :  { %v858_v44 = vmul.f32 1.442695, %v849_v15 }
 0x1e1   :  { %v826_v3 = vpop.xlane.xlu0 %825 }
 0x1e2   :  { %v848_v26 = vsub.f32 %v660_v48, %v826_v3  ;;  %v832_v48 = vpop.xlane.xlu1 %831 }
 0x1e4   :  { %v3253_v22 = vpop.eup %2544  ;;  %v856_v54 = vmul.f32 1.442695, %v848_v26 }
 0x1e5   :  { %v594_v9 = vsel %vm530_vm11, %v3253_v22, 0.0 }
 0x1e6   :  { %2546 = vpow2.f32 %v856_v54  ;;  %595 = vadd.xlane.f32.xlu0 %v594_v9 }
 0x1e7   :  { %2548 = vpow2.f32 %v862_v59 }
 0x1e9   :  { %v838_v49 = vpop.xlane.xlu0 %837 }
 0x1ea   :  { %v852_v43 = vsub.f32 %v752_v55, %v838_v49  ;;  %v850_v55 = vsub.f32 %v3209_v45, %v832_v48  ;;  %v536_v59 = vpop.xlane.xlu1 %535 }
 0x1eb   :  { %v556_v45 = vsub.f32 %v3199_v36, %v536_v59 }
 0x1ec   :  { %v3258_v1 = vpop.eup %2546  ;;  %v864_v10 = vmul.f32 1.442695, %v852_v43  ;;  %v860_v49 = vmul.f32 1.442695, %v850_v55 }
 0x1ed   :  { %v872_v3 = vsel %vm530_vm11, %v3258_v1, 0.0  ;;  %v3263_v26 = vpop.eup %2548 }
 0x1ee   :  { %2550 = vpow2.f32 %v864_v10  ;;  %873 = vadd.xlane.f32.xlu1 %v872_v3  ;;  %v881_v9 = vsel %vm530_vm11, %v3263_v26, 0.0 }
 0x1ef   :  { %2552 = vpow2.f32 %v858_v44 }
 0x1f1   :  { %v847_v16 = vpop.xlane.xlu0 %846 }
 0x1f2   :  { %v855_v35 = vsub.f32 %v3227_v2, %v847_v16  ;;  %v565_v16 = vmul.f32 1.442695, %v556_v45 }
 0x1f4   :  { %v3266_v54 = vpop.eup %2550  ;;  %v870_v19 = vmul.f32 1.442695, %v855_v35  ;;  %v539_v35 = vpop.xlane.xlu1 %538 }
 0x1f5   :  { %v884_v25 = vsel %vm530_vm11, %v3266_v54, 0.0  ;;  %v3273_v15 = vpop.eup %2552  ;;  %v557_v36 = vsub.f32 %v3201_v39, %v539_v35 }
 0x1f6   :  { %2554 = vpow2.f32 %v870_v19  ;;  %885 = vadd.xlane.f32.xlu2 %v884_v25  ;;  %882 = vadd.xlane.f32.xlu1 %v881_v9  ;;  %v875_v3 = vsel %vm530_vm11, %v3273_v15, 0.0 }
 0x1f7   :  { %2556 = vpow2.f32 %v860_v49 }
 0x1f9   :  { %v542_v43 = vpop.xlane.xlu0 %541 }
 0x1fa   :  { %v558_v2 = vsub.f32 %v3203_v40, %v542_v43  ;;  %v567_v43 = vmul.f32 1.442695, %v557_v36 }
 0x1fc   :  { %v3276_v10 = vpop.eup %2554  ;;  %v569_v48 = vmul.f32 1.442695, %v558_v2 }
 0x1fd   :  { %v893_v44 = vsel %vm530_vm11, %v3276_v10, 0.0  ;;  %v3283_v19 = vpop.eup %2556 }
 0x1fe   :  { %2558 = vpow2.f32 %v569_v48  ;;  %876 = vadd.xlane.f32.xlu2 %v875_v3  ;;  %894 = vadd.xlane.f32.xlu1 %v893_v44  ;;  %v878_v49 = vsel %vm530_vm11, %v3283_v19, 0.0 }
 0x1ff   :  { %2560 = vpow2.f32 %v565_v16 }
 0x201   :  { %v554_v55 = vpop.xlane.xlu0 %553 }
 0x202   :  { %v562_v40 = vsub.f32 %v3222_v24, %v554_v55 }
 0x204   :  { %v3286_v25 = vpop.eup %2558  ;;  %v577_v9 = vmul.f32 1.442695, %v562_v40 }
 0x205   :  { %v588_v59 = vsel %vm530_vm11, %v3286_v25, 0.0  ;;  %v3293_v45 = vpop.eup %2560 }
 0x206   :  { %2562 = vpow2.f32 %v577_v9  ;;  %589 = vadd.xlane.f32.xlu1 %v588_v59  ;;  %879 = vadd.xlane.f32.xlu2 %v878_v49  ;;  %v582_v44 = vsel %vm530_vm11, %v3293_v45, 0.0 }
 0x207   :  { %2564 = vpow2.f32 %v567_v43 }
 0x209   :  { %v551_v2 = vpop.xlane.xlu0 %550 }
 0x20a   :  { %v561_v24 = vsub.f32 %v3217_v5, %v551_v2 }
 0x20c   :  { %v3296_v48 = vpop.eup %2562  ;;  %v575_v39 = vmul.f32 1.442695, %v561_v24 }
 0x20d   :  { %v600_v3 = vsel %vm530_vm11, %v3296_v48, 0.0  ;;  %v3302_v16 = vpop.eup %2564 }
 0x20e   :  { %2566 = vpow2.f32 %v575_v39  ;;  %601 = vadd.xlane.f32.xlu1 %v600_v3  ;;  %583 = vadd.xlane.f32.xlu2 %v582_v44  ;;  %v585_v55 = vsel %vm530_vm11, %v3302_v16, 0.0 }
 0x214   :  { %v3304_v35 = vpop.eup %2566 }
 0x215   :  { %v597_v5 = vsel %vm530_vm11, %v3304_v35, 0.0 }
 0x216   :  { %598 = vadd.xlane.f32.xlu1 %v597_v5  ;;  %586 = vadd.xlane.f32.xlu2 %v585_v55 }
 0x21b   :  { %v581_v40 = vpop.xlane.xlu0 %580 }
 0x241   :  { %v593_v9 = vpop.xlane.xlu0 %592 }
 0x249   :  { %v889_v39 = vpop.xlane.xlu0 %888 }
 0x261   :  { %v874_v36 = vpop.xlane.xlu1 %873 }
 0x262   :  { %2568 = vrcp.f32 %v874_v36 }
 0x268   :  { %v2569_v59 = vpop.eup %2568 }
 0x269   :  { %v904_v49 = vmul.f32 %v2569_v59, %v3258_v1  ;;  %v886_v43 = vpop.xlane.xlu2 %885  ;;  %v883_v2 = vpop.xlane.xlu1 %882 }
 0x26a   :  { %2570 = vrcp.f32 %v886_v43 }
 0x26b   :  { %2572 = vrcp.f32 %v883_v2  ;;  %2409 = vmatmul.msk.f32.vlgmr.msrb.gmra.mxu3 %vm530_vm11, %v904_v49 }
 0x26c   :  { %2424 = vmatpush.msk.msrb.mxu3 %vm302_vm7, %v3156_v57  ;;  %2574 = vrcp.f32 %v581_v40 }
 0x270   :  { %v2571_v24 = vpop.eup %2570 }
 0x271   :  { %v2573_v3 = vpop.eup %2572  ;;  %v908_v44 = vmul.f32 %v2571_v24, %v3266_v54  ;;  %v877_v5 = vpop.xlane.xlu2 %876 }
 0x272   :  { %v895_v55 = vpop.xlane.xlu1 %894  ;;  %v907_v1 = vmul.f32 %v2573_v3, %v3263_v26  ;;  %2576 = vrcp.f32 %v877_v5  ;;  %v2575_v40 = vpop.eup %2574 }
 0x273   :  { %2578 = vrcp.f32 %v895_v55  ;;  %2417 = vmatmul.msk.f32.vlgmr.msra.gmra.mxu3 %vm530_vm11, %v908_v44  ;;  %v611_v26 = vmul.f32 %v2575_v40, %v3237_v53  ;;  %v892_v24 = vpop.xlane.xlu0 %891 }
 0x274   :  { %2415 = vmatmul.msk.f32.vlgmr.msra.gmra.mxu2 %vm530_vm11, %v907_v1  ;;  %2432 = vmatpush.msk.msra.mxu3 %vm302_vm7, %v3174_v4  ;;  %2580 = vrcp.f32 %v889_v39 }
 0x275   :  { %2430 = vmatpush.msk.msra.mxu2 %vm302_vm7, %v3162_v62  ;;  %2582 = vrcp.f32 %v593_v9 }
 0x278   :  { %v2577_v54 = vpop.eup %2576 }
 0x279   :  { %v2579_v36 = vpop.eup %2578  ;;  %v905_v59 = vmul.f32 %v2577_v54, %v3273_v15  ;;  %v880_v49 = vpop.xlane.xlu2 %879 }
 0x27a   :  { %v590_v43 = vpop.xlane.xlu1 %589  ;;  %v911_v2 = vmul.f32 %v2579_v36, %v3276_v10  ;;  %2584 = vrcp.f32 %v880_v49  ;;  %v2581_v53 = vpop.eup %2580 }
 0x27b   :  { %2586 = vrcp.f32 %v590_v43  ;;  %2411 = vmatmul.msk.f32.vlgmr.msrb.gmra.mxu0 %vm530_vm11, %v905_v59  ;;  %2425 = vmatmul.msk.f32.vlgmr.msrb.gmra.mxu3 %vm530_vm11, %v611_v26  ;;  %v2583_v15 = vpop.eup %2582  ;;  %v909_v39 = vmul.f32 %v2581_v53, %v3245_v60  ;;  %v596_v60 = vpop.xlane.xlu0 %595 }
 0x27c   :  { %2423 = vmatmul.msk.f32.vlgmr.msrb.gmra.mxu2 %vm530_vm11, %v911_v2  ;;  %2426 = vmatpush.msk.msrb.mxu0 %vm302_vm7, %v3127_v47  ;;  %2588 = vrcp.f32 %v892_v24  ;;  %v615_v1 = vmul.f32 %v2583_v15, %v3241_v34 }
 0x27d   :  { %2438 = vmatpush.msk.msrb.mxu2 %vm302_vm7, %v3189_v20  ;;  %2440 = vmatpush.xpose.msk.msrb.mxu3 %vm127_vm0, %v2971_v38 }
 0x280   :  { %v2585_v10 = vpop.eup %2584 }
 0x281   :  { %v2587_v9 = vpop.eup %2586  ;;  %v906_v3 = vmul.f32 %v2585_v10, %v3283_v19  ;;  %v584_v44 = vpop.xlane.xlu2 %583 }
 0x282   :  { %v602_v5 = vpop.xlane.xlu1 %601  ;;  %v614_v55 = vmul.f32 %v2587_v9, %v3286_v25  ;;  %2590 = vrcp.f32 %v584_v44  ;;  %v2589_v19 = vpop.eup %2588 }
 0x283   :  { %2592 = vrcp.f32 %v602_v5  ;;  %2413 = vmatmul.msk.f32.vlgmr.msrb.gmra.mxu1 %vm530_vm11, %v906_v3  ;;  %2419 = vmatmul.msk.f32.vlgmr.msra.gmra.mxu0 %vm530_vm11, %v909_v39  ;;  %v910_v40 = vmul.f32 %v2589_v19, %v3249_v31 }
 0x284   :  { %2428 = vmatpush.msk.msrb.mxu1 %vm302_vm7, %v3151_v56  ;;  %2431 = vmatmul.msk.f32.vlgmr.msra.gmra.mxu2 %vm530_vm11, %v614_v55  ;;  %2594 = vrcp.f32 %v596_v60 }
 0x285   :  { %2433 = vmatmul.msk.f32.vlgmr.msra.gmra.mxu3 %vm530_vm11, %v615_v1  ;;  %2434 = vmatpush.msk.msra.mxu0 %vm302_vm7, %v3179_v8 }
 0x286   :  { %2446 = vmatpush.xpose.msk.msra.mxu2 %vm127_vm0, %v3051_v7  ;;  %2448 = vmatpush.xpose.msk.msra.mxu3 %vm127_vm0, %v3083_v18 }
 0x288   :  { %v2591_v34 = vpop.eup %2590 }
 0x289   :  { %v2593_v25 = vpop.eup %2592  ;;  %v612_v54 = vmul.f32 %v2591_v34, %v3293_v45  ;;  %v587_v36 = vpop.xlane.xlu2 %586 }
 0x28a   :  { %v618_v26 = vmul.f32 %v2593_v25, %v3296_v48  ;;  %2596 = vrcp.f32 %v587_v36  ;;  %v599_v59 = vpop.xlane.xlu1 %598  ;;  %v2595_v31 = vpop.eup %2594 }
 0x28b   :  { %2421 = vmatmul.msk.f32.vlgmr.msra.gmra.mxu1 %vm530_vm11, %v910_v40  ;;  %2427 = vmatmul.msk.f32.vlgmr.msrb.gmra.mxu0 %vm530_vm11, %v612_v54  ;;  %2598 = vrcp.f32 %v599_v59  ;;  %v616_v45 = vmul.f32 %v2595_v31, %v3253_v22 }
 0x28c   :  { %2436 = vmatpush.msk.msra.mxu1 %vm302_vm7, %v3184_v11  ;;  %2439 = vmatmul.msk.f32.vlgmr.msrb.gmra.mxu2 %vm530_vm11, %v618_v26 }
 0x28d   :  { %2441 = vmatmul.msk.f32.vlgmr.msrb.gmra.mxu3 %vm127_vm0, %v1285_v32  ;;  %2442 = vmatpush.xpose.msk.msrb.mxu0 %vm127_vm0, %v2992_v46 }
 0x28e   :  { %2454 = vmatpush.xpose.msk.msrb.mxu2 %vm127_vm0, %v3130_v50  ;;  %2456 = vmatpush.msk.msrb.mxu3 %vm2941_vm5, %v3156_v57 }
 0x290   :  { %v2597_v21 = vpop.eup %2596 }
 0x291   :  { %v613_v48 = vmul.f32 %v2597_v21, %v3302_v16  ;;  %v2599_v32 = vpop.eup %2598 }
 0x293   :  { %2429 = vmatmul.msk.f32.vlgmr.msrb.gmra.mxu1 %vm530_vm11, %v613_v48  ;;  %2435 = vmatmul.msk.f32.vlgmr.msra.gmra.mxu0 %vm530_vm11, %v616_v45 }
 0x294   :  { %2444 = vmatpush.xpose.msk.msrb.mxu1 %vm127_vm0, %v3021_v58  ;;  %2447 = vmatmul.msk.f32.vlgmr.msra.gmra.mxu2 %vm127_vm0, %v1288_v0  ;;  %v617_v0 = vmul.f32 %v2599_v32, %v3304_v35 }
 0x295   :  { %2449 = vmatmul.msk.f32.vlgmr.msra.gmra.mxu3 %vm127_vm0, %v1289_v14  ;;  %2450 = vmatpush.xpose.msk.msra.mxu0 %vm127_vm0, %v3095_v23 }
 0x296   :  { %2462 = vmatpush.msk.msra.mxu2 %vm2941_vm5, %v3162_v62  ;;  %2464 = vmatpush.msk.msra.mxu3 %vm2941_vm5, %v3174_v4 }
 0x29b   :  { %2437 = vmatmul.msk.f32.vlgmr.msra.gmra.mxu1 %vm530_vm11, %v617_v0  ;;  %2443 = vmatmul.msk.f32.vlgmr.msrb.gmra.mxu0 %vm127_vm0, %v1286_v42 }
 0x29c   :  { %2452 = vmatpush.xpose.msk.msra.mxu1 %vm127_vm0, %v3110_v37  ;;  %2455 = vmatmul.msk.f32.vlgmr.msrb.gmra.mxu2 %vm127_vm0, %v1292_v17 }
 0x29d   :  { %2458 = vmatpush.msk.msrb.mxu0 %vm2941_vm5, %v3127_v47  ;;  %2470 = vmatpush.msk.msrb.mxu2 %vm2941_vm5, %v3189_v20 }
 0x2a3   :  { %2445 = vmatmul.msk.f32.vlgmr.msrb.gmra.mxu1 %vm127_vm0, %v1287_v52  ;;  %2451 = vmatmul.msk.f32.vlgmr.msra.gmra.mxu0 %vm127_vm0, %v1290_v33 }
 0x2a4   :  { %2460 = vmatpush.msk.msrb.mxu1 %vm2941_vm5, %v3151_v56  ;;  %2466 = vmatpush.msk.msra.mxu0 %vm2941_vm5, %v3179_v8 }
 0x2ab   :  { %2453 = vmatmul.msk.f32.vlgmr.msra.gmra.mxu1 %vm127_vm0, %v1291_v6 }
 0x2ac   :  { %2468 = vmatpush.msk.msra.mxu1 %vm2941_vm5, %v3184_v11 }
 0x2ee   :  { %v932_v42 = vpop.f32.mrf.mxu3 }
 0x2f6   :  { %v1024_v33 = vpop.f32.mrf.mxu3 }
 0x2f7   :  { %v1001_v52 = vpop.f32.mrf.mxu2 }
 0x2f8   :  { %v955_v14 = vpop.f32.mrf.mxu0 }
 0x2fe   :  { %v1116_v17 = vpop.f32.mrf.mxu3 }
 0x2ff   :  { %v1093_v22 = vpop.f32.mrf.mxu2  ;;  %v3446_v16 = vadd.f32 %v1116_v17, %v932_v42 }
 0x300   :  { %v978_v35 = vpop.f32.mrf.mxu1  ;;  %v1047_v49 = vpop.f32.mrf.mxu0 }
 0x307   :  { %v1185_v43 = vpop.f32.mrf.mxu2 }
 0x308   :  { %v3448_v2 = vadd.f32 %v1185_v43, %v1001_v52  ;;  %v1208_v24 = vpop.f32.mrf.mxu3  ;;  %v1070_v53 = vpop.f32.mrf.mxu1 }
 0x309   :  { %v3450_v6 = vadd.f32 %v1208_v24, %v1024_v33  ;;  %v1139_v15 = vpop.f32.mrf.mxu0 }
 0x30a   :  { %v3452_v27 = vadd.f32 %v1139_v15, %v955_v14 }
 0x30f   :  { %v1277_v10 = vpop.f32.mrf.mxu2 }
 0x310   :  { %v3454_v9 = vadd.f32 %v1277_v10, %v1093_v22  ;;  %v1321_v39 = vpop.f32.mrf.mxu3  ;;  %v1162_v3 = vpop.f32.mrf.mxu1 }
 0x311   :  { %v3456_v44 = vadd.f32 %v1162_v3, %v978_v35  ;;  %v1231_v5 = vpop.f32.mrf.mxu0  ;;  %v1485_v55 = vsel %vm530_vm11, %v1321_v39, -inf }
 0x312   :  { %v3459_v1 = vadd.f32 %v1231_v5, %v1047_v49  ;;  %1486 = vmax.xlane.f32.xlu2 %v1485_v55 }
 0x317   :  { %v1390_v60 = vpop.f32.mrf.mxu2 }
 0x318   :  { %v1413_v19 = vpop.f32.mrf.mxu3  ;;  %v1494_v34 = vsel %vm530_vm11, %v1390_v60, -inf  ;;  %v1254_v25 = vpop.f32.mrf.mxu1 }
 0x319   :  { %v1344_v40 = vpop.f32.mrf.mxu0  ;;  %v1497_v54 = vsel %vm530_vm11, %v1413_v19, -inf  ;;  %v3463_v36 = vadd.f32 %v1254_v25, %v1070_v53 }
 0x31a   :  { %1498 = vmax.xlane.f32.xlu0 %v1497_v54  ;;  %1495 = vmax.xlane.f32.xlu2 %v1494_v34  ;;  %v1488_v26 = vsel %vm530_vm11, %v1344_v40, -inf }
 0x31b   :  { %1489 = vmax.xlane.f32.xlu1 %v1488_v26 }
 0x31f   :  { %v1482_v59 = vpop.f32.mrf.mxu2 }
 0x320   :  { %v1506_v31 = vsel %vm530_vm11, %v1482_v59, -inf  ;;  %v1367_v21 = vpop.f32.mrf.mxu1 }
 0x321   :  { %v1436_v45 = vpop.f32.mrf.mxu0  ;;  %v1491_v48 = vsel %vm530_vm11, %v1367_v21, -inf }
 0x322   :  { %1507 = vmax.xlane.f32.xlu2 %v1506_v31  ;;  %v1500_v32 = vsel %vm530_vm11, %v1436_v45, -inf  ;;  %1492 = vmax.xlane.f32.xlu0 %v1491_v48 }
 0x323   :  { %1501 = vmax.xlane.f32.xlu1 %v1500_v32 }
 0x328   :  { %v1459_v0 = vpop.f32.mrf.mxu1 }
 0x329   :  { %v1503_v42 = vsel %vm530_vm11, %v1459_v0, -inf }
 0x32a   :  { %1504 = vmax.xlane.f32.xlu0 %v1503_v42 }
 0x385   :  { %v1487_v33 = vpop.xlane.xlu2 %1486 }
 0x386   :  { %v1509_v52 = vsub.f32 %v1321_v39, %v1487_v33 }
 0x388   :  { %v1517_v14 = vmul.f32 1.442695, %v1509_v52 }
 0x38a   :  { %2600 = vpow2.f32 %v1517_v14 }
 0x38d   :  { %v1499_v17 = vpop.xlane.xlu0 %1498  ;;  %v1496_v22 = vpop.xlane.xlu2 %1495 }
 0x38e   :  { %v1513_v35 = vsub.f32 %v1413_v19, %v1499_v17  ;;  %v1512_v49 = vsub.f32 %v1390_v60, %v1496_v22  ;;  %v1490_v43 = vpop.xlane.xlu1 %1489 }
 0x38f   :  { %v1510_v24 = vsub.f32 %v1344_v40, %v1490_v43 }
 0x390   :  { %v2601_v53 = vpop.eup %2600  ;;  %v1525_v15 = vmul.f32 1.442695, %v1513_v35  ;;  %v1523_v10 = vmul.f32 1.442695, %v1512_v49 }
 0x391   :  { %v1519_v3 = vmul.f32 1.442695, %v1510_v24  ;;  %v1533_v5 = vsel %vm530_vm11, %v2601_v53, 0.0 }
 0x392   :  { %2602 = vpow2.f32 %v1525_v15  ;;  %1534 = vadd.xlane.f32.xlu1 %v1533_v5 }
 0x393   :  { %2604 = vpow2.f32 %v1523_v10 }
 0x394   :  { %2606 = vpow2.f32 %v1519_v3 }
 0x395   :  { %v1508_v55 = vpop.xlane.xlu2 %1507  ;;  %v1493_v39 = vpop.xlane.xlu0 %1492 }
 0x396   :  { %v1516_v34 = vsub.f32 %v1482_v59, %v1508_v55  ;;  %v1511_v25 = vsub.f32 %v1367_v21, %v1493_v39  ;;  %v1502_v54 = vpop.xlane.xlu1 %1501 }
 0x397   :  { %v1514_v26 = vsub.f32 %v1436_v45, %v1502_v54 }
 0x398   :  { %v2603_v19 = vpop.eup %2602  ;;  %v1531_v60 = vmul.f32 1.442695, %v1516_v34  ;;  %v1521_v31 = vmul.f32 1.442695, %v1511_v25 }
 0x399   :  { %v2605_v40 = vpop.eup %2604  ;;  %v1527_v48 = vmul.f32 1.442695, %v1514_v26  ;;  %v1545_v32 = vsel %vm530_vm11, %v2603_v19, 0.0 }
 0x39a   :  { %v2607_v42 = vpop.eup %2606  ;;  %2608 = vpow2.f32 %v1531_v60  ;;  %v1542_v33 = vsel %vm530_vm11, %v2605_v40, 0.0  ;;  %1546 = vadd.xlane.f32.xlu2 %v1545_v32 }
 0x39b   :  { %2610 = vpow2.f32 %v1521_v31  ;;  %1543 = vadd.xlane.f32.xlu1 %v1542_v33  ;;  %v1536_v52 = vsel %vm530_vm11, %v2607_v42, 0.0 }
 0x39c   :  { %2612 = vpow2.f32 %v1527_v48  ;;  %1537 = vadd.xlane.f32.xlu0 %v1536_v52 }
 0x39d   :  { %v1505_v59 = vpop.xlane.xlu0 %1504 }
 0x39e   :  { %v1515_v21 = vsub.f32 %v1459_v0, %v1505_v59 }
 0x3a0   :  { %v2609_v45 = vpop.eup %2608  ;;  %v1529_v14 = vmul.f32 1.442695, %v1515_v21 }
 0x3a1   :  { %v2611_v17 = vpop.eup %2610  ;;  %v1554_v22 = vsel %vm530_vm11, %v2609_v45, 0.0 }
 0x3a2   :  { %v2613_v35 = vpop.eup %2612  ;;  %2614 = vpow2.f32 %v1529_v14  ;;  %v1539_v49 = vsel %vm530_vm11, %v2611_v17, 0.0 }
 0x3a3   :  { %1555 = vadd.xlane.f32.xlu1 %v1554_v22  ;;  %1540 = vadd.xlane.f32.xlu2 %v1539_v49  ;;  %v1548_v43 = vsel %vm530_vm11, %v2613_v35, 0.0 }
 0x3a4   :  { %1549 = vadd.xlane.f32.xlu0 %v1548_v43 }
 0x3a8   :  { %v2615_v24 = vpop.eup %2614 }
 0x3a9   :  { %v1551_v15 = vsel %vm530_vm11, %v2615_v24, 0.0 }
 0x3ab   :  { %1552 = vadd.xlane.f32.xlu2 %v1551_v15 }
 0x405   :  { %v1535_v10 = vpop.xlane.xlu1 %1534 }
 0x406   :  { %2616 = vrcp.f32 %v1535_v10 }
 0x40c   :  { %v2617_v0 = vpop.eup %2616 }
 0x40d   :  { %v1565_v3 = vmul.f32 %v2617_v0, %v2601_v53  ;;  %v1547_v5 = vpop.xlane.xlu2 %1546 }
 0x40e   :  { %2618 = vrcp.f32 %v1547_v5  ;;  %v1544_v55 = vpop.xlane.xlu1 %1543 }
 0x40f   :  { %2620 = vrcp.f32 %v1544_v55  ;;  %v1538_v39 = vpop.xlane.xlu0 %1537  ;;  %2457 = vmatmul.msk.f32.vlgmr.msrb.gmra.mxu3 %vm530_vm11, %v1565_v3 }
 0x410   :  { %2622 = vrcp.f32 %v1538_v39  ;;  %2472 = vmatpush.xpose.msk.msrb.mxu3 %vm127_vm0, %v2971_v38 }
 0x414   :  { %v2619_v34 = vpop.eup %2618 }
 0x415   :  { %v2621_v25 = vpop.eup %2620  ;;  %v1569_v54 = vmul.f32 %v2619_v34, %v2603_v19 }
 0x416   :  { %v2623_v26 = vpop.eup %2622  ;;  %v1568_v60 = vmul.f32 %v2621_v25, %v2605_v40  ;;  %v1556_v31 = vpop.xlane.xlu1 %1555 }
 0x417   :  { %v1541_v48 = vpop.xlane.xlu2 %1540  ;;  %v1566_v32 = vmul.f32 %v2623_v26, %v2607_v42  ;;  %2624 = vrcp.f32 %v1556_v31  ;;  %v1550_v53 = vpop.xlane.xlu0 %1549  ;;  %2465 = vmatmul.msk.f32.vlgmr.msra.gmra.mxu3 %vm530_vm11, %v1569_v54 }
 0x418   :  { %2626 = vrcp.f32 %v1541_v48  ;;  %2463 = vmatmul.msk.f32.vlgmr.msra.gmra.mxu2 %vm530_vm11, %v1568_v60  ;;  %2480 = vmatpush.xpose.msk.msra.mxu3 %vm127_vm0, %v3083_v18  ;;  %v3663_v18 = vsel %vm2949_vm6, %v2947_v29, 0.0 }
 0x419   :  { %2628 = vrcp.f32 %v1550_v53  ;;  %2478 = vmatpush.xpose.msk.msra.mxu2 %vm127_vm0, %v3051_v7  ;;  %2459 = vmatmul.msk.f32.vlgmr.msrb.gmra.mxu0 %vm530_vm11, %v1566_v32  ;;  %v3664_v7 = vsel %vm2949_vm6, %v3067_v12, 0.0  ;;  %v3669_v12 = vsel %vm2949_vm6, %v2945_v28, 0.0 }
 0x41a   :  { %2474 = vmatpush.xpose.msk.msrb.mxu0 %vm127_vm0, %v2992_v46 }
 0x41d   :  { %v2625_v38 = vpop.eup %2624 }
 0x41e   :  { %v2627_v19 = vpop.eup %2626  ;;  %v1572_v40 = vmul.f32 %v2625_v38, %v2609_v45 }
 0x41f   :  { %v1553_v42 = vpop.xlane.xlu2 %1552  ;;  %v2629_v33 = vpop.eup %2628  ;;  %v1567_v52 = vmul.f32 %v2627_v19, %v2611_v17  ;;  %2473 = vmatmul.msk.f32.vlgmr.msrb.gmra.mxu3 %vm127_vm0, %v3663_v18 }
 0x420   :  { %2630 = vrcp.f32 %v1553_v42  ;;  %v1570_v59 = vmul.f32 %v2629_v33, %v2613_v35  ;;  %2471 = vmatmul.msk.f32.vlgmr.msrb.gmra.mxu2 %vm530_vm11, %v1572_v40  ;;  %2488 = vmatpush.msk.msrb.mxu3 %vm2949_vm6, %v3156_v57 }
 0x421   :  { %2486 = vmatpush.xpose.msk.msrb.mxu2 %vm127_vm0, %v3130_v50  ;;  %2461 = vmatmul.msk.f32.vlgmr.msrb.gmra.mxu1 %vm530_vm11, %v1567_v52  ;;  %v3665_v50 = vsel %vm2949_vm6, %v3031_v61, 0.0  ;;  %v3667_v61 = vsel %vm2949_vm6, %v3069_v13, 0.0 }
 0x422   :  { %2467 = vmatmul.msk.f32.vlgmr.msra.gmra.mxu0 %vm530_vm11, %v1570_v59  ;;  %2476 = vmatpush.xpose.msk.msrb.mxu1 %vm127_vm0, %v3021_v58  ;;  %v3666_v58 = vsel %vm2949_vm6, %v2980_v41, 0.0  ;;  %v3668_v41 = vsel %vm2949_vm6, %v3009_v51, 0.0  ;;  %v3670_v51 = vsel %vm2949_vm6, %v3036_v63, 0.0 }
 0x423   :  { %2482 = vmatpush.xpose.msk.msra.mxu0 %vm127_vm0, %v3095_v23 }
 0x426   :  { %v2631_v29 = vpop.eup %2630 }
 0x427   :  { %v1571_v46 = vmul.f32 %v2631_v29, %v2615_v24  ;;  %2481 = vmatmul.msk.f32.vlgmr.msra.gmra.mxu3 %vm127_vm0, %v3664_v7 }
 0x428   :  { %2479 = vmatmul.msk.f32.vlgmr.msra.gmra.mxu2 %vm127_vm0, %v3665_v50  ;;  %2496 = vmatpush.msk.msra.mxu3 %vm2949_vm6, %v3174_v4 }
 0x429   :  { %2494 = vmatpush.msk.msra.mxu2 %vm2949_vm6, %v3162_v62  ;;  %2469 = vmatmul.msk.f32.vlgmr.msra.gmra.mxu1 %vm530_vm11, %v1571_v46 }
 0x42a   :  { %2475 = vmatmul.msk.f32.vlgmr.msrb.gmra.mxu0 %vm127_vm0, %v3666_v58  ;;  %2484 = vmatpush.xpose.msk.msra.mxu1 %vm127_vm0, %v3110_v37 }
 0x42b   :  { %2490 = vmatpush.msk.msrb.mxu0 %vm2949_vm6, %v3127_v47 }
 0x430   :  { %2487 = vmatmul.msk.f32.vlgmr.msrb.gmra.mxu2 %vm127_vm0, %v3667_v61 }
 0x431   :  { %2502 = vmatpush.msk.msrb.mxu2 %vm2949_vm6, %v3189_v20  ;;  %2477 = vmatmul.msk.f32.vlgmr.msrb.gmra.mxu1 %vm127_vm0, %v3668_v41 }
 0x432   :  { %2483 = vmatmul.msk.f32.vlgmr.msra.gmra.mxu0 %vm127_vm0, %v3669_v12  ;;  %2492 = vmatpush.msk.msrb.mxu1 %vm2949_vm6, %v3151_v56 }
 0x433   :  { %2498 = vmatpush.msk.msra.mxu0 %vm2949_vm6, %v3179_v8 }
 0x439   :  { %2485 = vmatmul.msk.f32.vlgmr.msra.gmra.mxu1 %vm127_vm0, %v3670_v51 }
 0x43a   :  { %2500 = vmatpush.msk.msra.mxu1 %vm2949_vm6, %v3184_v11 }
 0x492   :  { %v1593_v28 = vpop.f32.mrf.mxu3 }
 0x493   :  { %v3567_v13 = vadd.f32 %v1593_v28, %v3446_v16 }
 0x496   :  { %v1616_v23 = vpop.f32.mrf.mxu0 }
 0x497   :  { %v3570_v37 = vadd.f32 %v1616_v23, %v3452_v27 }
 0x49a   :  { %v1685_v47 = vpop.f32.mrf.mxu3 }
 0x49b   :  { %v1662_v56 = vpop.f32.mrf.mxu2  ;;  %v3573_v57 = vadd.f32 %v1685_v47, %v3450_v6 }
 0x49c   :  { %v3576_v63 = vadd.f32 %v1662_v56, %v3448_v2 }
 0x49e   :  { %v1639_v62 = vpop.f32.mrf.mxu1 }
 0x49f   :  { %v3579_v30 = vadd.f32 %v1639_v62, %v3456_v44  ;;  %v1708_v4 = vpop.f32.mrf.mxu0 }
 0x4a0   :  { %v3582_v8 = vadd.f32 %v1708_v4, %v3459_v1 }
 0x4a2   :  { %v1806_v11 = vpop.f32.mrf.mxu3 }
 0x4a3   :  { %v1754_v20 = vpop.f32.mrf.mxu2  ;;  %v1970_v16 = vsel %vm530_vm11, %v1806_v11, -inf }
 0x4a4   :  { %v3586_v27 = vadd.f32 %v1754_v20, %v3454_v9  ;;  %1971 = vmax.xlane.f32.xlu0 %v1970_v16 }
 0x4a6   :  { %v1731_v6 = vpop.f32.mrf.mxu1 }
 0x4a7   :  { %v3589_v2 = vadd.f32 %v1731_v6, %v3463_v36  ;;  %v1829_v21 = vpop.f32.mrf.mxu0 }
 0x4a8   :  { %v1973_v44 = vsel %vm530_vm11, %v1829_v21, -inf }
 0x4a9   :  { %1974 = vmax.xlane.f32.xlu1 %v1973_v44 }
 0x4aa   :  { %v1898_v35 = vpop.f32.mrf.mxu3 }
 0x4ab   :  { %v1875_v45 = vpop.f32.mrf.mxu2  ;;  %v1982_v24 = vsel %vm530_vm11, %v1898_v35, -inf }
 0x4ac   :  { %v1979_v9 = vsel %vm530_vm11, %v1875_v45, -inf }
 0x4ae   :  { %v1852_v14 = vpop.f32.mrf.mxu1 }
 0x4af   :  { %v1921_v1 = vpop.f32.mrf.mxu0  ;;  %v1976_v17 = vsel %vm530_vm11, %v1852_v14, -inf }
 0x4b0   :  { %1977 = vmax.xlane.f32.xlu2 %v1976_v17  ;;  %v1985_v22 = vsel %vm530_vm11, %v1921_v1, -inf }
 0x4b1   :  { %1986 = vmax.xlane.f32.xlu0 %v1985_v22  ;;  %1980 = vmax.xlane.f32.xlu1 %v1979_v9 }
 0x4b3   :  { %v1967_v49 = vpop.f32.mrf.mxu2 }
 0x4b4   :  { %v1991_v15 = vsel %vm530_vm11, %v1967_v49, -inf }
 0x4b6   :  { %v1944_v36 = vpop.f32.mrf.mxu1 }
 0x4b7   :  { %v1988_v43 = vsel %vm530_vm11, %v1944_v36, -inf }
 0x4b8   :  { %1989 = vmax.xlane.f32.xlu2 %v1988_v43 }
 0x4b9   :  { %1983 = vmax.xlane.f32.xlu1 %v1982_v24  ;;  %1992 = vmax.xlane.f32.xlu0 %v1991_v15 }
 0x517   :  { %v1972_v10 = vpop.xlane.xlu0 %1971 }
 0x518   :  { %v1994_v0 = vsub.f32 %v1806_v11, %v1972_v10 }
 0x51a   :  { %v2002_v3 = vmul.f32 1.442695, %v1994_v0 }
 0x51c   :  { %2632 = vpow2.f32 %v2002_v3  ;;  %v1975_v5 = vpop.xlane.xlu1 %1974 }
 0x51d   :  { %v1995_v55 = vsub.f32 %v1829_v21, %v1975_v5 }
 0x51f   :  { %v2004_v39 = vmul.f32 1.442695, %v1995_v55 }
 0x521   :  { %2634 = vpow2.f32 %v2004_v39 }
 0x522   :  { %v2633_v34 = vpop.eup %2632 }
 0x523   :  { %v1978_v25 = vpop.xlane.xlu2 %1977  ;;  %v2018_v54 = vsel %vm530_vm11, %v2633_v34, 0.0 }
 0x524   :  { %v1996_v26 = vsub.f32 %v1852_v14, %v1978_v25  ;;  %v1987_v60 = vpop.xlane.xlu0 %1986  ;;  %v1981_v31 = vpop.xlane.xlu1 %1980  ;;  %2019 = vadd.xlane.f32.xlu2 %v2018_v54 }
 0x525   :  { %v1999_v48 = vsub.f32 %v1921_v1, %v1987_v60  ;;  %v1997_v32 = vsub.f32 %v1875_v45, %v1981_v31  ;;  %v2253_v45 = vld [vmem:[#allocation10 + $0x18] sm:$0xff]  ;;  %v2251_v60 = vld [vmem:[#allocation10 + $0x8] sm:$0xff]  ;;  %v2250_v31 = vld [vmem:[#allocation10] sm:$0xff] }
 0x526   :  { %v2006_v53 = vmul.f32 1.442695, %v1996_v26  ;;  %v2252_v26 = vld [vmem:[#allocation10 + $0x10] sm:$0xff] }
 0x527   :  { %v2635_v38 = vpop.eup %2634  ;;  %v2012_v19 = vmul.f32 1.442695, %v1999_v48  ;;  %v2008_v40 = vmul.f32 1.442695, %v1997_v32 }
 0x528   :  { %2636 = vpow2.f32 %v2006_v53  ;;  %v2021_v42 = vsel %vm530_vm11, %v2635_v38, 0.0 }
 0x529   :  { %2638 = vpow2.f32 %v2012_v19  ;;  %2022 = vadd.xlane.f32.xlu0 %v2021_v42 }
 0x52a   :  { %2640 = vpow2.f32 %v2008_v40 }
 0x52b   :  { %v1990_v33 = vpop.xlane.xlu2 %1989 }
 0x52c   :  { %v2000_v52 = vsub.f32 %v1944_v36, %v1990_v33  ;;  %v1993_v18 = vpop.xlane.xlu0 %1992  ;;  %v1984_v59 = vpop.xlane.xlu1 %1983 }
 0x52d   :  { %v2001_v29 = vsub.f32 %v1967_v49, %v1993_v18  ;;  %v1998_v46 = vsub.f32 %v1898_v35, %v1984_v59 }
 0x52e   :  { %v2637_v7 = vpop.eup %2636  ;;  %v2014_v50 = vmul.f32 1.442695, %v2000_v52 }
 0x52f   :  { %v2639_v58 = vpop.eup %2638  ;;  %v2016_v61 = vmul.f32 1.442695, %v2001_v29  ;;  %v2010_v41 = vmul.f32 1.442695, %v1998_v46  ;;  %v2024_v12 = vsel %vm530_vm11, %v2637_v7, 0.0 }
 0x530   :  { %v2641_v51 = vpop.eup %2640  ;;  %2642 = vpow2.f32 %v2014_v50  ;;  %v2033_v28 = vsel %vm530_vm11, %v2639_v58, 0.0  ;;  %2025 = vadd.xlane.f32.xlu1 %v2024_v12 }
 0x531   :  { %2644 = vpow2.f32 %v2016_v61  ;;  %2034 = vadd.xlane.f32.xlu2 %v2033_v28  ;;  %v2027_v23 = vsel %vm530_vm11, %v2641_v51, 0.0 }
 0x532   :  { %2646 = vpow2.f32 %v2010_v41  ;;  %2028 = vadd.xlane.f32.xlu0 %v2027_v23 }
 0x536   :  { %v2643_v47 = vpop.eup %2642 }
 0x537   :  { %v2645_v56 = vpop.eup %2644  ;;  %v2036_v62 = vsel %vm530_vm11, %v2643_v47, 0.0 }
 0x538   :  { %v2647_v4 = vpop.eup %2646  ;;  %2037 = vadd.xlane.f32.xlu1 %v2036_v62  ;;  %v2039_v11 = vsel %vm530_vm11, %v2645_v56, 0.0 }
 0x539   :  { %2040 = vadd.xlane.f32.xlu2 %v2039_v11  ;;  %v2030_v20 = vsel %vm530_vm11, %v2647_v4, 0.0 }
 0x53a   :  { %2031 = vadd.xlane.f32.xlu0 %v2030_v20 }
 0x597   :  { %v2020_v16 = vpop.xlane.xlu2 %2019 }
 0x598   :  { %2648 = vrcp.f32 %v2020_v16 }
 0x59c   :  { %v2023_v6 = vpop.xlane.xlu0 %2022 }
 0x59d   :  { %2650 = vrcp.f32 %v2023_v6 }
 0x59e   :  { %v2649_v21 = vpop.eup %2648 }
 0x59f   :  { %v2050_v44 = vmul.f32 %v2649_v21, %v2633_v34 }
 0x5a1   :  { %2489 = vmatmul.msk.f32.vlgmr.msrb.gmra.mxu3 %vm530_vm11, %v2050_v44 }
 0x5a2   :  { %2520 = vmatpush.msrb.mxu3 %v2253_v45 }
 0x5a3   :  { %v2651_v14 = vpop.eup %2650  ;;  %v2026_v1 = vpop.xlane.xlu1 %2025 }
 0x5a4   :  { %v2051_v17 = vmul.f32 %v2651_v14, %v2635_v38  ;;  %v2035_v22 = vpop.xlane.xlu2 %2034  ;;  %2652 = vrcp.f32 %v2026_v1  ;;  %2521 = vmatpush.msrb.mxu3 %v2252_v26 }
 0x5a5   :  { %2654 = vrcp.f32 %v2035_v22  ;;  %v2029_v9 = vpop.xlane.xlu0 %2028 }
 0x5a6   :  { %2656 = vrcp.f32 %v2029_v9  ;;  %2491 = vmatmul.msk.f32.vlgmr.msrb.gmra.mxu0 %vm530_vm11, %v2051_v17  ;;  %2522 = vmatpush.msrb.mxu3 %v2251_v60 }
 0x5a7   :  { %2294 = vmatpush.msrb.mxu0 %v2253_v45 }
 0x5a8   :  { %2523 = vmatpush.msrb.mxu3 %v2250_v31 }
 0x5a9   :  { %2295 = vmatpush.msrb.mxu0 %v2252_v26 }
 0x5aa   :  { %v2653_v35 = vpop.eup %2652 }
 0x5ab   :  { %v2655_v49 = vpop.eup %2654  ;;  %v2052_v36 = vmul.f32 %v2653_v35, %v2637_v7  ;;  %v2038_v43 = vpop.xlane.xlu1 %2037  ;;  %2296 = vmatpush.msrb.mxu0 %v2251_v60 }
 0x5ac   :  { %v2657_v24 = vpop.eup %2656  ;;  %v2055_v15 = vmul.f32 %v2655_v49, %v2639_v58  ;;  %v2041_v10 = vpop.xlane.xlu2 %2040  ;;  %2658 = vrcp.f32 %v2038_v43 }
 0x5ad   :  { %v2053_v0 = vmul.f32 %v2657_v24, %v2641_v51  ;;  %2660 = vrcp.f32 %v2041_v10  ;;  %v2032_v3 = vpop.xlane.xlu0 %2031  ;;  %2493 = vmatmul.msk.f32.vlgmr.msrb.gmra.mxu1 %vm530_vm11, %v2052_v36  ;;  %2297 = vmatpush.msrb.mxu0 %v2250_v31 }
 0x5ae   :  { %2662 = vrcp.f32 %v2032_v3  ;;  %2499 = vmatmul.msk.f32.vlgmr.msra.gmra.mxu0 %vm530_vm11, %v2055_v15 }
 0x5af   :  { %2495 = vmatmul.msk.f32.vlgmr.msra.gmra.mxu2 %vm530_vm11, %v2053_v0 }
 0x5b2   :  { %v2659_v5 = vpop.eup %2658 }
 0x5b3   :  { %v2661_v55 = vpop.eup %2660  ;;  %v2056_v39 = vmul.f32 %v2659_v5, %v2643_v47 }
 0x5b4   :  { %v2663_v34 = vpop.eup %2662  ;;  %v2057_v25 = vmul.f32 %v2661_v55, %v2645_v56 }
 0x5b5   :  { %v2054_v54 = vmul.f32 %v2663_v34, %v2647_v4  ;;  %2501 = vmatmul.msk.f32.vlgmr.msra.gmra.mxu1 %vm530_vm11, %v2056_v39 }
 0x5b7   :  { %2497 = vmatmul.msk.f32.vlgmr.msra.gmra.mxu3 %vm530_vm11, %v2054_v54  ;;  %2503 = vmatmul.msk.f32.vlgmr.msrb.gmra.mxu2 %vm530_vm11, %v2057_v25 }
 0x623   :  { %v2101_v48 = vpop.f32.mrf.mxu0 }
 0x624   :  { %v2078_v32 = vpop.f32.mrf.mxu3  ;;  %v2243_v42 = vadd.f32 %v2101_v48, %v3570_v37 }
 0x625   :  { %v2242_v53 = vadd.f32 %v2078_v32, %v3567_v13 }
 0x627   :  { %2504 = vmatmul.msk.f32.vlgmr.msrb.gmra.mxu0 %vm127_vm0, %v2242_v53 }
 0x62a   :  { %v2124_v38 = vpop.f32.mrf.mxu1 }
 0x62b   :  { %v2193_v19 = vpop.f32.mrf.mxu0  ;;  %v2244_v59 = vadd.f32 %v2124_v38, %v3579_v30  ;;  %v2535_v30 = vld [vmem:[%s3655_s8] ss:$0 sm:$0xff]  ;;  %s2823_s8 = smov [#allocation11]  }
 0x62c   :  { %v2247_v40 = vadd.f32 %v2193_v19, %v3582_v8  ;;  %s2335_s15 = sshll.u32 %s2823_s8, 4  ;;  %s2336_s15 = int_to_ptr.vmem [resolvable:$true] %s2335_s15 }
 0x62e   :  { %2509 = vmatmul.msk.f32.vlgmr.msrb.gmra.mxu3 %vm127_vm0, %v2247_v40 }
 0x62f   :  { %2505 = vmatmul.msk.f32.gmra.mxu0 %vm127_vm0, %v2243_v42 }
 0x632   :  { %v2147_v33 = vpop.f32.mrf.mxu2  ;;  %v2216_v52 = vpop.f32.mrf.mxu1 }
 0x633   :  { %v2248_v18 = vadd.f32 %v2216_v52, %v3589_v2  ;;  %v2245_v8 = vadd.f32 %v2147_v33, %v3576_v63 }
 0x636   :  { %2510 = vmatmul.msk.f32.gmra.mxu3 %vm127_vm0, %v2248_v18 }
 0x637   :  { %2506 = vmatmul.msk.f32.gmra.mxu0 %vm127_vm0, %v2244_v59 }
 0x63a   :  { %v2239_v13 = vpop.f32.mrf.mxu2  ;;  %v2170_v37 = vpop.f32.mrf.mxu3 }
 0x63b   :  { %v2249_v29 = vadd.f32 %v2239_v13, %v3586_v27  ;;  %v2246_v46 = vadd.f32 %v2170_v37, %v3573_v57 }
 0x63e   :  { %2511 = vmatmul.msk.f32.gmra.mxu3 %vm127_vm0, %v2249_v29 }
 0x63f   :  { %2507 = vmatmul.msk.f32.gmra.mxu0 %vm127_vm0, %v2245_v8 }
 0x647   :  { %2508 = vmatmul.msk.f32.gmra.mxu0 %vm127_vm0, %v2246_v46 }
 0x6a4   :  { %v2299_v2 = vpop.f32.mrf.mxu0 }
 0x6a5   :  { %v2300_v7 = vadd.f32 %v2535_v30, %v2299_v2 }
 0x6a7   :  { %2323 = vst.msk [vmem:[#allocation11] sm:$0xff] %vm127_vm0, %v2300_v7 }
 0x6ac   :  { %v2302_v27 = vpop.f32.mrf.mxu0 }
 0x6ad   :  { %v2303_v50 = vadd.f32 %v2535_v30, %v2302_v27 }
 0x6af   :  { %2324 = vst.msk [vmem:[#allocation11 + $0x8] sm:$0xff] %vm127_vm0, %v2303_v50 }
 0x6b1   :  { %v2314_v63 = vpop.f32.mrf.mxu3 }
 0x6b2   :  { %v2315_v58 = vadd.f32 %v2535_v30, %v2314_v63 }
 0x6b4   :  { %2328 = vst.msk [vmem:[#allocation11 + $0x28] sm:$0xff] %vm127_vm0, %v2315_v58  ;;  %v2305_v61 = vpop.f32.mrf.mxu0 }
 0x6b5   :  { %v2306_v57 = vadd.f32 %v2535_v30, %v2305_v61 }
 0x6b7   :  { %2325 = vst.msk [vmem:[#allocation11 + $0x10] sm:$0xff] %vm127_vm0, %v2306_v57 }
 0x6b9   :  { %v2317_v41 = vpop.f32.mrf.mxu3 }
 0x6ba   :  { %v2318_v12 = vadd.f32 %v2535_v30, %v2317_v41 }
 0x6bc   :  { %2329 = vst.msk [vmem:[#allocation11 + $0x30] sm:$0xff] %vm127_vm0, %v2318_v12  ;;  %v2308_v51 = vpop.f32.mrf.mxu0 }
 0x6bd   :  { %v2309_v28 = vadd.f32 %v2535_v30, %v2308_v51 }
 0x6bf   :  { %2326 = vst.msk [vmem:[#allocation11 + $0x18] sm:$0xff] %vm127_vm0, %v2309_v28 }
 0x6c1   :  { %v2320_v23 = vpop.f32.mrf.mxu3 }
 0x6c2   :  { %v2321_v47 = vadd.f32 %v2535_v30, %v2320_v23 }
 0x6c4   :  { %2330 = vst.msk [vmem:[#allocation11 + $0x38] sm:$0xff] %vm127_vm0, %v2321_v47  ;;  %v2311_v56 = vpop.f32.mrf.mxu0 }
 0x6c5   :  { %v2312_v62 = vadd.f32 %v2535_v30, %v2311_v56 }
 0x6c7   :  { %2327 = vst.msk [vmem:[#allocation11 + $0x20] sm:$0xff] %vm127_vm0, %v2312_v62 }
 0x6c8   :  { %2343 = dma.vmem_to_hbm [thread:$0]  %s2336_s15, 1024, %s2338_s20, [#allocation4], %s2817_s17, %s2817_s17, %s2818_s18  }
 0x6c9   :  { %2814 = dma.done.wait [#allocation4], 1024  }
 0x6ca   :  { %2815 = vsyncadd [#allocation4], 4294966272 }
 0x6cb   :  { %2348 = vsyncpa [#allocation3], 1 }
 0x6cc   :  { %2349 = vsyncpa [#allocation6], 1 }
 0x6cd   :  { %2350 = vsyncpa [#allocation9], 1 }
 0x6ce   :  { %2351 = vsyncpa [#allocation4], 1 }

</bundles_post_ra>
